<compile_context>
chip_gen: v7x
topology: tpu7x:2x2x1
jax: 0.10.0
libtpu: 0.0.40
codegen_flags: <defaults>
</compile_context>

<pallas_src>
import math

import jax
import jax.numpy as jnp
from jax.experimental import pallas as pl
from jax.experimental.pallas import tpu as pltpu

IMG_H, IMG_W = 64, 64          # small synthetic image (module hardcodes 800x1280)
C_FEAT = 64                    # backbone feature channels (module uses 1024)
HIDDEN = 256                   # fastrcnn fc width (module uses 1024)
NUM_CLASS = 4
C_MASK = 32                    # mask-head intermediate channels (module uses 256)
ROI_SIZE = 14
SPATIAL_SCALE = 0.0625
HEAD_N = (NUM_CLASS + 1) + NUM_CLASS * 4      # 21 fused cls+box outputs
HEAD_N_PAD = 128                              # zero-padded N -> lane-dense store
CLIP_H, CLIP_W = IMG_H, IMG_W  # NOTE: reference module hardcodes (800, 1280) for its real input
BBOX_XFORM_CLIP = math.log(1000.0 / 16.0)     # torchvision-style dw/dh clamp


# ----------------------------------------------------------------------------
# Generic Pallas matmul + bias kernel.
#   grid = (M_tiles, K_tiles); output block resident across the K axis and
#   accumulated in place (no VMEM scratch); bias folded into the first K step.
# ----------------------------------------------------------------------------
def _matmul_bias_kernel(x_ref, w_ref, b_ref, o_ref):
    kk = pl.program_id(1)
    acc = jnp.dot(x_ref[...], w_ref[...], preferred_element_type=jnp.float32)

    @pl.when(kk == 0)
    def _first():
        o_ref[...] = acc + b_ref[...]

    @pl.when(kk != 0)
    def _rest():
        o_ref[...] += acc


def _tile_candidates(dim, align, cap):
    """Divisors of `dim` that are multiples of `align` and <= cap (plus `dim`
    itself when it already fits), largest first."""
    cands = set()
    if dim <= cap:
        cands.add(dim)
    t = align
    while t <= min(dim, cap):
        if dim % t == 0:
            cands.add(t)
        t += align
    if not cands:
        cands.add(dim)          # fall back to a single full-extent block
    return sorted(cands, reverse=True)


def _pick_tiles(m, k, n, budget_bytes=12 * 1024 * 1024):
    """Largest (tm, tk) whose working set (double-buffered bf16 input blocks +
    resident fp32 output block + bias) fits a conservative VMEM budget.
    tm aligned to 16 (bf16 sublane pack), tk aligned to 128 (lane)."""
    tm_cands = _tile_candidates(m, 16, 512)
    tk_cands = _tile_candidates(k, 128, 2048)
    for tm in tm_cands:
        for tk in tk_cands:
            working = 2 * (tm * tk * 2 + tk * n * 2) + tm * n * 4 + n * 4
            if working <= budget_bytes:
                return tm, tk
    return tm_cands[-1], tk_cands[-1]


def matmul_bias(x, w, b):
    """(M, K) @ (K, N) + (N,), bf16 inputs, fp32 accumulation, fp32 output.
    K is never zero-padded in HBM (full-extent K block when K fits, otherwise a
    128-aligned divisor of K)."""
    m, k = x.shape
    k2, n = w.shape
    assert k == k2
    x = x.astype(jnp.bfloat16)
    w = w.astype(jnp.bfloat16)
    b2 = b.reshape(1, n).astype(jnp.float32)
    tm, tk = _pick_tiles(m, k, n)
    return pl.pallas_call(
        _matmul_bias_kernel,
        out_shape=jax.ShapeDtypeStruct((m, n), jnp.float32),
        grid_spec=pltpu.PrefetchScalarGridSpec(
            num_scalar_prefetch=0,
            grid=(m // tm, k // tk),
            in_specs=[
                pl.BlockSpec((tm, tk), lambda i, kk: (i, kk)),
                pl.BlockSpec((tk, n), lambda i, kk: (kk, 0)),
                pl.BlockSpec((1, n), lambda i, kk: (0, 0)),
            ],
            out_specs=pl.BlockSpec((tm, n), lambda i, kk: (i, 0)),
        ),
        compiler_params=pltpu.CompilerParams(
            dimension_semantics=("parallel", "arbitrary"),
            vmem_limit_bytes=32 * 1024 * 1024),
    )(x, w, b2)


# ----------------------------------------------------------------------------
# RoIAlign as a scalar-prefetch gather kernel: per (roi, bin) the 4 bilinear tap
# indices (int32) and weights (f32) live in SMEM; the feature map stays resident
# in VMEM and the 4-tap blend runs on the VPU.
# ----------------------------------------------------------------------------
def _roi_align_kernel(idx_ref, wt_ref, feat_ref, out_ref):
    r = pl.program_id(0)
    nbins = ROI_SIZE * ROI_SIZE
    base = r * nbins * 4

    def body(b, carry):
        off = base + b * 4
        row = wt_ref[off] * feat_ref[pl.ds(idx_ref[off], 1), :]
        row += wt_ref[off + 1] * feat_ref[pl.ds(idx_ref[off + 1], 1), :]
        row += wt_ref[off + 2] * feat_ref[pl.ds(idx_ref[off + 2], 1), :]
        row += wt_ref[off + 3] * feat_ref[pl.ds(idx_ref[off + 3], 1), :]
        out_ref[pl.ds(b, 1), :] = row
        return carry

    jax.lax.fori_loop(0, nbins, body, 0)


def roi_align(feats, idx, wt, num_rois):
    """feats: (HW, C) f32; idx/wt: flat (R*196*4,) taps. Returns (R, 196, C) f32."""
    hw, c = feats.shape
    nbins = ROI_SIZE * ROI_SIZE
    return pl.pallas_call(
        _roi_align_kernel,
        out_shape=jax.ShapeDtypeStruct((num_rois, nbins, c), jnp.float32),
        grid_spec=pltpu.PrefetchScalarGridSpec(
            num_scalar_prefetch=2,                     # tap indices + tap weights
            grid=(num_rois,),
            in_specs=[pl.BlockSpec((hw, c), lambda r, *_: (0, 0))],
            out_specs=pl.BlockSpec((None, nbins, c), lambda r, *_: (r, 0, 0)),
        ),
        compiler_params=pltpu.CompilerParams(
            dimension_semantics=("parallel",)),
    )(idx, wt, feats)


# ----------------------------------------------------------------------------
# Glue (plain JAX): RoIAlign tap construction, box decoding.
# ----------------------------------------------------------------------------
def build_roi_taps(boxes, feat_h, feat_w, out_h, out_w, scale):
    """Flat 4-tap bilinear indices (int32) and weights (f32), one sample per bin
    center (same math as the previous dense interp matrix)."""
    x1 = boxes[:, 0] * scale
    y1 = boxes[:, 1] * scale
    x2 = boxes[:, 2] * scale
    y2 = boxes[:, 3] * scale
    roi_w = jnp.maximum(x2 - x1, 1.0)
    roi_h = jnp.maximum(y2 - y1, 1.0)
    bin_w = roi_w / out_w
    bin_h = roi_h / out_h
    iy = jnp.arange(out_h, dtype=jnp.float32) + 0.5
    ix = jnp.arange(out_w, dtype=jnp.float32) + 0.5
    sy = y1[:, None, None] + iy[None, :, None] * bin_h[:, None, None]
    sx = x1[:, None, None] + ix[None, None, :] * bin_w[:, None, None]
    sy = jnp.broadcast_to(sy, (boxes.shape[0], out_h, out_w))
    sx = jnp.broadcast_to(sx, (boxes.shape[0], out_h, out_w))

    valid = ((sy >= -1.0) & (sy <= feat_h) &
             (sx >= -1.0) & (sx <= feat_w)).astype(jnp.float32)
    sy = jnp.clip(sy, 0.0, feat_h - 1.0)
    sx = jnp.clip(sx, 0.0, feat_w - 1.0)
    y0 = jnp.minimum(jnp.floor(sy), feat_h - 1.0)
    x0 = jnp.minimum(jnp.floor(sx), feat_w - 1.0)
    yh = jnp.minimum(y0 + 1.0, feat_h - 1.0)
    xh = jnp.minimum(x0 + 1.0, feat_w - 1.0)
    ly = sy - y0
    lx = sx - x0
    hy = 1.0 - ly
    hx = 1.0 - lx

    w00 = hy * hx * valid
    w01 = hy * lx * valid
    w10 = ly * hx * valid
    w11 = ly * lx * valid
    i00 = y0 * feat_w + x0
    i01 = y0 * feat_w + xh
    i10 = yh * feat_w + x0
    i11 = yh * feat_w + xh

    idx = jnp.stack([i00, i01, i10, i11], axis=-1).astype(jnp.int32).reshape(-1)
    wt = jnp.stack([w00, w01, w10, w11], axis=-1).astype(jnp.float32).reshape(-1)
    return idx, wt


def apply_delta_to_proposals(proposals, deltas, weights):
    wx, wy, ww, wh = weights
    widths = proposals[:, 2] - proposals[:, 0]
    heights = proposals[:, 3] - proposals[:, 1]
    ctr_x = proposals[:, 0] + 0.5 * widths
    ctr_y = proposals[:, 1] + 0.5 * heights
    dx = deltas[:, 0] / wx
    dy = deltas[:, 1] / wy
    dw = jnp.minimum(deltas[:, 2] / ww, BBOX_XFORM_CLIP)
    dh = jnp.minimum(deltas[:, 3] / wh, BBOX_XFORM_CLIP)
    pcx = dx * widths + ctr_x
    pcy = dy * heights + ctr_y
    pw = jnp.exp(dw) * widths
    ph = jnp.exp(dh) * heights
    return jnp.stack([pcx - 0.5 * pw, pcy - 0.5 * ph,
                      pcx + 0.5 * pw, pcy + 0.5 * ph], axis=1)


# ----------------------------------------------------------------------------
# Parameters (deterministic synthetic init; fusions precomputed here).
# ----------------------------------------------------------------------------
def init_params(key):
    ks = jax.random.split(key, 12)

    def w(k, shape, scale=0.02):
        return scale * jax.random.normal(k, shape, jnp.float32)

    w_bb = w(ks[0], (16 * 16 * 3, C_FEAT))
    b_bb = jnp.zeros((C_FEAT,), jnp.float32)
    w_fc = w(ks[1], (ROI_SIZE * ROI_SIZE * C_FEAT, HIDDEN))
    b_fc = w(ks[2], (HIDDEN,))
    w_cls = w(ks[3], (HIDDEN, NUM_CLASS + 1))
    b_cls = w(ks[4], (NUM_CLASS + 1,))
    w_box = w(ks[5], (HIDDEN, NUM_CLASS * 4))
    b_box = w(ks[6], (NUM_CLASS * 4,))
    # ConvTranspose2d(C_FEAT, C_MASK, 2, 2) flattened to (C_FEAT, 2*2*C_MASK)
    w_dec = w(ks[7], (C_FEAT, 4 * C_MASK))
    b_dec = w(ks[8], (C_MASK,))
    # Conv2d(C_MASK, NUM_CLASS, 1)
    w_m = w(ks[9], (C_MASK, NUM_CLASS))
    b_m = w(ks[10], (NUM_CLASS,))

    # Fused cls + box heads (exact: both read the same fc output, no nonlinearity),
    # zero-padded along N to 128 for a lane-dense output store.
    w_head = jnp.concatenate([w_cls, w_box], axis=1)                 # (HIDDEN, 21)
    b_head = jnp.concatenate([b_cls, b_box])
    w_head = jnp.pad(w_head, ((0, 0), (0, HEAD_N_PAD - HEAD_N)))
    b_head = jnp.pad(b_head, ((0, HEAD_N_PAD - HEAD_N),))

    # Fused mask head: ConvTranspose2d(2,2) immediately followed by the 1x1 conv
    # (no nonlinearity in the reference nn.Sequential) -> fold into one matmul.
    w_mask = jnp.einsum("kdc,cn->kdn",
                        w_dec.reshape(C_FEAT, 4, C_MASK), w_m)       # (C_FEAT,4,NCLS)
    w_mask = w_mask.reshape(C_FEAT, 4 * NUM_CLASS)
    b_mask = jnp.tile(b_dec @ w_m + b_m, 4)

    return {
        "w_bb": w_bb.astype(jnp.bfloat16), "b_bb": b_bb,
        "w_fc": w_fc.astype(jnp.bfloat16), "b_fc": b_fc,
        "w_head": w_head.astype(jnp.bfloat16), "b_head": b_head,
        "w_mask": w_mask.astype(jnp.bfloat16), "b_mask": b_mask,
    }


# ----------------------------------------------------------------------------
# Forward pass (inference branch of TinyMaskRcnn).
# ----------------------------------------------------------------------------
def tiny_mask_rcnn_forward(params, x_nchw, proposals):
    # ---- backbone ---------------------------------------------------------
    # TODO(synk): TinyBackbone's definition is not in the source; stand-in is a
    # single stride-16 16x16 patchify conv implemented as a Pallas matmul
    # (produces a stride-16 feature map, matching spatial_scale=0.0625).
    # TODO(synk): at the module's real 800x1280 input the patchify transpose/copy
    # should be folded into the kernel's index_map / manual DMA instead of XLA ops.
    x = jnp.transpose(x_nchw, (0, 2, 3, 1))           # NCHW -> NHWC
    n, h, w_, c = x.shape
    ph, pw = h // 16, w_ // 16
    patches = x.reshape(n, ph, 16, pw, 16, c).transpose(0, 1, 3, 2, 4, 5)
    patches = patches.reshape(n * ph * pw, 16 * 16 * c)
    feats = matmul_bias(patches, params["w_bb"], params["b_bb"])    # (HW, C) f32

    # ---- RPN --------------------------------------------------------------
    # TODO(synk): TinyRPN is not defined in the source; deterministic proposals
    # are provided from outside instead.
    r = proposals.shape[0]

    # ---- RoIAlign (4-tap bilinear gather kernel) ----------------------------
    # TODO(synk): exact torchvision sampling_ratio=0 uses a data-dependent number
    # of samples per bin; one bilinear sample per bin center is used here.
    idx, wt = build_roi_taps(proposals, ph, pw, ROI_SIZE, ROI_SIZE, SPATIAL_SCALE)
    feature_map = roi_align(feats, idx, wt, r)         # (R, 196, C) f32

    # ---- box branch (fc -> fused cls+box head) ------------------------------
    box_feature = feature_map.reshape(r, ROI_SIZE * ROI_SIZE * C_FEAT)
    box_feature = matmul_bias(box_feature, params["w_fc"], params["b_fc"])
    head_out = matmul_bias(box_feature, params["w_head"], params["b_head"])
    pred_class_scores = head_out[:, :NUM_CLASS + 1]
    pred_bbox_deltas = head_out[:, NUM_CLASS + 1:HEAD_N]

    # ---- inference post-processing ------------------------------------------
    scores = jax.nn.softmax(pred_class_scores, axis=1)[:, 1:]      # drop background
    props_rep = jnp.broadcast_to(proposals[:, None, :],
                                 (r, NUM_CLASS, 4)).reshape(-1, 4)
    boxes = apply_delta_to_proposals(props_rep,
                                     pred_bbox_deltas.reshape(r * NUM_CLASS, 4),
                                     weights=(10.0, 10.0, 5.0, 5.0))
    boxes = jnp.stack([jnp.clip(boxes[:, 0], 0.0, CLIP_W),
                       jnp.clip(boxes[:, 1], 0.0, CLIP_H),
                       jnp.clip(boxes[:, 2], 0.0, CLIP_W),
                       jnp.clip(boxes[:, 3], 0.0, CLIP_H)], axis=1)
    boxes = boxes.reshape(r, NUM_CLASS, 4)
    # TODO(synk): score-threshold filtering, batched_nms and the dynamic-shape
    # mask_postprocess (per-box F.interpolate + paste) need dynamic shapes and
    # have no clean static-shape Pallas equivalent; masks are produced for all
    # proposals / all classes instead.

    # ---- mask head (ConvTranspose2d(2,2) + 1x1 conv fused into one matmul) ---
    logits = matmul_bias(feature_map.reshape(r * ROI_SIZE * ROI_SIZE, C_FEAT),
                         params["w_mask"], params["b_mask"])    # (R*196, 2*2*NCLS)
    logits = logits.reshape(r, ROI_SIZE, ROI_SIZE, 2, 2, NUM_CLASS)
    logits = logits.transpose(0, 1, 3, 2, 4, 5).reshape(
        r, 2 * ROI_SIZE, 2 * ROI_SIZE, NUM_CLASS)
    mask_probs = jax.nn.sigmoid(logits.transpose(0, 3, 1, 2))   # (R, NCLS, 28, 28)

    return boxes, scores, mask_probs


if __name__ == "__main__":
    key = jax.random.PRNGKey(0)
    k_params, k_x = jax.random.split(key)
    params = init_params(k_params)
    x = jax.random.normal(k_x, (1, 3, IMG_H, IMG_W), jnp.float32)   # NCHW input
    proposals = jnp.array([[0., 0., 16., 16.],
                           [8., 8., 40., 40.],
                           [16., 0., 48., 32.],
                           [0., 16., 32., 64.],
                           [24., 24., 56., 56.],
                           [4., 12., 20., 44.],
                           [32., 16., 64., 48.],
                           [8., 0., 64., 64.]], dtype=jnp.float32)

    fwd = jax.jit(tiny_mask_rcnn_forward)
    boxes, scores, mask_probs = fwd(params, x, proposals)
    jax.block_until_ready((boxes, scores, mask_probs))
    assert boxes.shape == (8, NUM_CLASS, 4)
    assert scores.shape == (8, NUM_CLASS)
    assert mask_probs.shape == (8, NUM_CLASS, 28, 28)
    print("KERNEL_OK")
</pallas_src>

<mosaic_0001>
module attributes {stable_mosaic.version = 11 : i64} {
  func.func @_matmul_bias_kernel(%arg0: i32, %arg1: i32, %arg2: memref<16x768xbf16, #tpu.memory_space<vmem>>, %arg3: memref<768x64xbf16, #tpu.memory_space<vmem>>, %arg4: memref<1x64xf32, #tpu.memory_space<vmem>>, %arg5: memref<16x64xf32, #tpu.memory_space<vmem>>) attributes {dimension_semantics = [#tpu.dimension_semantics<parallel>, #tpu.dimension_semantics<arbitrary>], iteration_bounds = array<i64: 1, 1>, scalar_prefetch = 0 : i64, scratch_operands = 0 : i64, tpu.core_type = #tpu.core_type<tc>, window_params = [{transform_indices = @transform_0, window_bounds = array<i64: 16, 768>}, {transform_indices = @transform_1, window_bounds = array<i64: 768, 64>}, {pipeline_mode = #tpu.pipeline_mode<synchronous>, transform_indices = @transform_2, window_bounds = array<i64: 1, 64>}, {transform_indices = @transform_3, window_bounds = array<i64: 16, 64>}]} {
    %c0 = arith.constant 0 : index
    %c0_0 = arith.constant 0 : index
    %0 = vector.load %arg2[%c0, %c0_0] : memref<16x768xbf16, #tpu.memory_space<vmem>>, vector<16x768xbf16>
    %c0_1 = arith.constant 0 : index
    %c0_2 = arith.constant 0 : index
    %1 = vector.load %arg3[%c0_1, %c0_2] : memref<768x64xbf16, #tpu.memory_space<vmem>>, vector<768x64xbf16>
    %cst = arith.constant dense<0.000000e+00> : vector<16x64xf32>
    %2 = tpu.matmul %0, %1, %cst {dimension_numbers = #tpu.dot_dimension_numbers<[1], [0], [0], [1], [0, 0, 1, 1], [], []>} : vector<16x768xbf16>, vector<768x64xbf16>, vector<16x64xf32> -> vector<16x64xf32>
    %c0_i32 = arith.constant 0 : i32
    %3 = arith.cmpi eq, %arg1, %c0_i32 : i32
    %4 = arith.extui %3 : i1 to i32
    %c0_i32_3 = arith.constant 0 : i32
    %5 = arith.cmpi ne, %4, %c0_i32_3 : i32
    scf.if %5 {
      %c0_6 = arith.constant 0 : index
      %c0_7 = arith.constant 0 : index
      %9 = vector.load %arg4[%c0_6, %c0_7] : memref<1x64xf32, #tpu.memory_space<vmem>>, vector<1x64xf32>
      %10 = vector.broadcast %9 : vector<1x64xf32> to vector<16x64xf32>
      %11 = arith.addf %2, %10 : vector<16x64xf32>
      %c0_8 = arith.constant 0 : index
      %c0_9 = arith.constant 0 : index
      %12 = vector.load %arg5[%c0_8, %c0_9] : memref<16x64xf32, #tpu.memory_space<vmem>>, vector<16x64xf32>
      tpu.vector_store %arg5[%c0_8, %c0_9], %11 {strides = array<i32>} : memref<16x64xf32, #tpu.memory_space<vmem>>, vector<16x64xf32>,
    } else {
    }
    %c0_i32_4 = arith.constant 0 : i32
    %6 = arith.cmpi ne, %arg1, %c0_i32_4 : i32
    %7 = arith.extui %6 : i1 to i32
    %c0_i32_5 = arith.constant 0 : i32
    %8 = arith.cmpi ne, %7, %c0_i32_5 : i32
    scf.if %8 {
      %c0_6 = arith.constant 0 : index
      %c0_7 = arith.constant 0 : index
      %9 = vector.load %arg5[%c0_6, %c0_7] : memref<16x64xf32, #tpu.memory_space<vmem>>, vector<16x64xf32>
      %10 = arith.addf %9, %2 : vector<16x64xf32>
      %c0_8 = arith.constant 0 : index
      %c0_9 = arith.constant 0 : index
      %11 = vector.load %arg5[%c0_8, %c0_9] : memref<16x64xf32, #tpu.memory_space<vmem>>, vector<16x64xf32>
      tpu.vector_store %arg5[%c0_8, %c0_9], %10 {strides = array<i32>} : memref<16x64xf32, #tpu.memory_space<vmem>>, vector<16x64xf32>,
    } else {
    }
    return
  }
  func.func @transform_0(%arg0: i32, %arg1: i32) -> (i32, i32) {
    %c0_i32 = arith.constant 0 : i32
    return %arg0, %arg1 : i32, i32
  }
  func.func @transform_1(%arg0: i32, %arg1: i32) -> (i32, i32) {
    %c0_i32 = arith.constant 0 : i32
    %c0_i32_0 = arith.constant 0 : i32
    return %arg1, %c0_i32 : i32, i32
  }
  func.func @transform_2(%arg0: i32, %arg1: i32) -> (i32, i32) {
    %c0_i32 = arith.constant 0 : i32
    %c0_i32_0 = arith.constant 0 : i32
    %c0_i32_1 = arith.constant 0 : i32
    return %c0_i32, %c0_i32_0 : i32, i32
  }
  func.func @transform_3(%arg0: i32, %arg1: i32) -> (i32, i32) {
    %c0_i32 = arith.constant 0 : i32
    %c0_i32_0 = arith.constant 0 : i32
    return %arg0, %c0_i32 : i32, i32
  }
}

module attributes {stable_mosaic.version = 11 : i64} {
  func.func @_roi_align_kernel(%arg0: i32, %arg1: memref<6272xi32, #tpu.memory_space<smem>>, %arg2: memref<6272xf32, #tpu.memory_space<smem>>, %arg3: memref<16x64xf32, #tpu.memory_space<vmem>>, %arg4: memref<1x196x64xf32, #tpu.memory_space<vmem>>) attributes {dimension_semantics = [#tpu.dimension_semantics<parallel>], iteration_bounds = array<i64: 8>, scalar_prefetch = 2 : i64, scratch_operands = 0 : i64, tpu.core_type = #tpu.core_type<tc>, window_params = [{pipeline_mode = #tpu.pipeline_mode<synchronous>, transform_indices = @transform_0, window_bounds = array<i64: 16, 64>}, {transform_indices = @transform_1, window_bounds = array<i64: 1, 196, 64>}]} {
    %c196_i32 = arith.constant 196 : i32
    %0 = arith.muli %arg0, %c196_i32 : i32
    %c4_i32 = arith.constant 4 : i32
    %1 = arith.muli %0, %c4_i32 : i32
    %c0_i32 = arith.constant 0 : i32
    %c196_i32_0 = arith.constant 196 : i32
    %2 = arith.addi %c0_i32, %c196_i32_0 : i32
    %c1_i32 = arith.constant 1 : i32
    scf.for %arg5 = %c0_i32 to %2 step %c1_i32  : i32 {
      %c4_i32_2 = arith.constant 4 : i32
      %3 = arith.muli %arg5, %c4_i32_2 : i32
      %4 = arith.addi %1, %3 : i32
      %5 = arith.index_cast %4 : i32 to index
      %6 = memref.load %arg2[%5] : memref<6272xf32, #tpu.memory_space<smem>>
      %7 = arith.index_cast %4 : i32 to index
      %8 = memref.load %arg1[%7] : memref<6272xi32, #tpu.memory_space<smem>>
      %9 = arith.index_cast %8 : i32 to index
      %c0 = arith.constant 0 : index
      %10 = vector.load %arg3[%9, %c0] : memref<16x64xf32, #tpu.memory_space<vmem>>, vector<1x64xf32>
      %11 = vector.broadcast %6 : f32 to vector<1x64xf32>
      %12 = arith.mulf %11, %10 : vector<1x64xf32>
      %c1_i32_3 = arith.constant 1 : i32
      %13 = arith.addi %4, %c1_i32_3 : i32
      %14 = arith.index_cast %13 : i32 to index
      %15 = memref.load %arg2[%14] : memref<6272xf32, #tpu.memory_space<smem>>
      %c1_i32_4 = arith.constant 1 : i32
      %16 = arith.addi %4, %c1_i32_4 : i32
      %17 = arith.index_cast %16 : i32 to index
      %18 = memref.load %arg1[%17] : memref<6272xi32, #tpu.memory_space<smem>>
      %19 = arith.index_cast %18 : i32 to index
      %c0_5 = arith.constant 0 : index
      %20 = vector.load %arg3[%19, %c0_5] : memref<16x64xf32, #tpu.memory_space<vmem>>, vector<1x64xf32>
      %21 = vector.broadcast %15 : f32 to vector<1x64xf32>
      %22 = arith.mulf %21, %20 : vector<1x64xf32>
      %23 = arith.addf %12, %22 : vector<1x64xf32>
      %c2_i32 = arith.constant 2 : i32
      %24 = arith.addi %4, %c2_i32 : i32
      %25 = arith.index_cast %24 : i32 to index
      %26 = memref.load %arg2[%25] : memref<6272xf32, #tpu.memory_space<smem>>
      %c2_i32_6 = arith.constant 2 : i32
      %27 = arith.addi %4, %c2_i32_6 : i32
      %28 = arith.index_cast %27 : i32 to index
      %29 = memref.load %arg1[%28] : memref<6272xi32, #tpu.memory_space<smem>>
      %30 = arith.index_cast %29 : i32 to index
      %c0_7 = arith.constant 0 : index
      %31 = vector.load %arg3[%30, %c0_7] : memref<16x64xf32, #tpu.memory_space<vmem>>, vector<1x64xf32>
      %32 = vector.broadcast %26 : f32 to vector<1x64xf32>
      %33 = arith.mulf %32, %31 : vector<1x64xf32>
      %34 = arith.addf %23, %33 : vector<1x64xf32>
      %c3_i32 = arith.constant 3 : i32
      %35 = arith.addi %4, %c3_i32 : i32
      %36 = arith.index_cast %35 : i32 to index
      %37 = memref.load %arg2[%36] : memref<6272xf32, #tpu.memory_space<smem>>
      %c3_i32_8 = arith.constant 3 : i32
      %38 = arith.addi %4, %c3_i32_8 : i32
      %39 = arith.index_cast %38 : i32 to index
      %40 = memref.load %arg1[%39] : memref<6272xi32, #tpu.memory_space<smem>>
      %41 = arith.index_cast %40 : i32 to index
      %c0_9 = arith.constant 0 : index
      %42 = vector.load %arg3[%41, %c0_9] : memref<16x64xf32, #tpu.memory_space<vmem>>, vector<1x64xf32>
      %43 = vector.broadcast %37 : f32 to vector<1x64xf32>
      %44 = arith.mulf %43, %42 : vector<1x64xf32>
      %45 = arith.addf %34, %44 : vector<1x64xf32>
      %c0_10 = arith.constant 0 : index
      %46 = arith.index_cast %arg5 : i32 to index
      %c0_11 = arith.constant 0 : index
      %47 = vector.load %arg4[%c0_10, %46, %c0_11] : memref<1x196x64xf32, #tpu.memory_space<vmem>>, vector<1x1x64xf32>
      %48 = vector.shape_cast %47 : vector<1x1x64xf32> to vector<1x64xf32>
      %49 = vector.shape_cast %45 : vector<1x64xf32> to vector<1x1x64xf32>
      tpu.vector_store %arg4[%c0_10, %46, %c0_11], %49 {strides = array<i32>} : memref<1x196x64xf32, #tpu.memory_space<vmem>>, vector<1x1x64xf32>,
    }
    %c196_i32_1 = arith.constant 196 : i32
    return
  }
  func.func @transform_0(%arg0: i32, %arg1: memref<6272xi32, #tpu.memory_space<smem>>, %arg2: memref<6272xf32, #tpu.memory_space<smem>>) -> (i32, i32) {
    %c0_i32 = arith.constant 0 : i32
    %c0_i32_0 = arith.constant 0 : i32
    %c0_i32_1 = arith.constant 0 : i32
    return %c0_i32, %c0_i32_0 : i32, i32
  }
  func.func @transform_1(%arg0: i32, %arg1: memref<6272xi32, #tpu.memory_space<smem>>, %arg2: memref<6272xf32, #tpu.memory_space<smem>>) -> (i32, i32, i32) {
    %c0_i32 = arith.constant 0 : i32
    %c0_i32_0 = arith.constant 0 : i32
    %c0_i32_1 = arith.constant 0 : i32
    return %arg0, %c0_i32, %c0_i32_0 : i32, i32, i32
  }
}

module attributes {stable_mosaic.version = 11 : i64} {
  func.func @_matmul_bias_kernel(%arg0: i32, %arg1: i32, %arg2: memref<8x1792xbf16, #tpu.memory_space<vmem>>, %arg3: memref<1792x256xbf16, #tpu.memory_space<vmem>>, %arg4: memref<1x256xf32, #tpu.memory_space<vmem>>, %arg5: memref<8x256xf32, #tpu.memory_space<vmem>>) attributes {dimension_semantics = [#tpu.dimension_semantics<parallel>, #tpu.dimension_semantics<arbitrary>], iteration_bounds = array<i64: 1, 7>, scalar_prefetch = 0 : i64, scratch_operands = 0 : i64, tpu.core_type = #tpu.core_type<tc>, window_params = [{transform_indices = @transform_0, window_bounds = array<i64: 8, 1792>}, {transform_indices = @transform_1, window_bounds = array<i64: 1792, 256>}, {pipeline_mode = #tpu.pipeline_mode<synchronous>, transform_indices = @transform_2, window_bounds = array<i64: 1, 256>}, {transform_indices = @transform_3, window_bounds = array<i64: 8, 256>}]} {
    %c0 = arith.constant 0 : index
    %c0_0 = arith.constant 0 : index
    %0 = vector.load %arg2[%c0, %c0_0] : memref<8x1792xbf16, #tpu.memory_space<vmem>>, vector<8x1792xbf16>
    %c0_1 = arith.constant 0 : index
    %c0_2 = arith.constant 0 : index
    %1 = vector.load %arg3[%c0_1, %c0_2] : memref<1792x256xbf16, #tpu.memory_space<vmem>>, vector<1792x256xbf16>
    %cst = arith.constant dense<0.000000e+00> : vector<8x256xf32>
    %2 = tpu.matmul %0, %1, %cst {dimension_numbers = #tpu.dot_dimension_numbers<[1], [0], [0], [1], [0, 0, 1, 1], [], []>} : vector<8x1792xbf16>, vector<1792x256xbf16>, vector<8x256xf32> -> vector<8x256xf32>
    %c0_i32 = arith.constant 0 : i32
    %3 = arith.cmpi eq, %arg1, %c0_i32 : i32
    %4 = arith.extui %3 : i1 to i32
    %c0_i32_3 = arith.constant 0 : i32
    %5 = arith.cmpi ne, %4, %c0_i32_3 : i32
    scf.if %5 {
      %c0_6 = arith.constant 0 : index
      %c0_7 = arith.constant 0 : index
      %9 = vector.load %arg4[%c0_6, %c0_7] : memref<1x256xf32, #tpu.memory_space<vmem>>, vector<1x256xf32>
      %10 = vector.broadcast %9 : vector<1x256xf32> to vector<8x256xf32>
      %11 = arith.addf %2, %10 : vector<8x256xf32>
      %c0_8 = arith.constant 0 : index
      %c0_9 = arith.constant 0 : index
      %12 = vector.load %arg5[%c0_8, %c0_9] : memref<8x256xf32, #tpu.memory_space<vmem>>, vector<8x256xf32>
      tpu.vector_store %arg5[%c0_8, %c0_9], %11 {strides = array<i32>} : memref<8x256xf32, #tpu.memory_space<vmem>>, vector<8x256xf32>,
    } else {
    }
    %c0_i32_4 = arith.constant 0 : i32
    %6 = arith.cmpi ne, %arg1, %c0_i32_4 : i32
    %7 = arith.extui %6 : i1 to i32
    %c0_i32_5 = arith.constant 0 : i32
    %8 = arith.cmpi ne, %7, %c0_i32_5 : i32
    scf.if %8 {
      %c0_6 = arith.constant 0 : index
      %c0_7 = arith.constant 0 : index
      %9 = vector.load %arg5[%c0_6, %c0_7] : memref<8x256xf32, #tpu.memory_space<vmem>>, vector<8x256xf32>
      %10 = arith.addf %9, %2 : vector<8x256xf32>
      %c0_8 = arith.constant 0 : index
      %c0_9 = arith.constant 0 : index
      %11 = vector.load %arg5[%c0_8, %c0_9] : memref<8x256xf32, #tpu.memory_space<vmem>>, vector<8x256xf32>
      tpu.vector_store %arg5[%c0_8, %c0_9], %10 {strides = array<i32>} : memref<8x256xf32, #tpu.memory_space<vmem>>, vector<8x256xf32>,
    } else {
    }
    return
  }
  func.func @transform_0(%arg0: i32, %arg1: i32) -> (i32, i32) {
    %c0_i32 = arith.constant 0 : i32
    return %arg0, %arg1 : i32, i32
  }
  func.func @transform_1(%arg0: i32, %arg1: i32) -> (i32, i32) {
    %c0_i32 = arith.constant 0 : i32
    %c0_i32_0 = arith.constant 0 : i32
    return %arg1, %c0_i32 : i32, i32
  }
  func.func @transform_2(%arg0: i32, %arg1: i32) -> (i32, i32) {
    %c0_i32 = arith.constant 0 : i32
    %c0_i32_0 = arith.constant 0 : i32
    %c0_i32_1 = arith.constant 0 : i32
    return %c0_i32, %c0_i32_0 : i32, i32
  }
  func.func @transform_3(%arg0: i32, %arg1: i32) -> (i32, i32) {
    %c0_i32 = arith.constant 0 : i32
    %c0_i32_0 = arith.constant 0 : i32
    return %arg0, %c0_i32 : i32, i32
  }
}

module attributes {stable_mosaic.version = 11 : i64} {
  func.func @_matmul_bias_kernel(%arg0: i32, %arg1: i32, %arg2: memref<8x256xbf16, #tpu.memory_space<vmem>>, %arg3: memref<256x128xbf16, #tpu.memory_space<vmem>>, %arg4: memref<1x128xf32, #tpu.memory_space<vmem>>, %arg5: memref<8x128xf32, #tpu.memory_space<vmem>>) attributes {dimension_semantics = [#tpu.dimension_semantics<parallel>, #tpu.dimension_semantics<arbitrary>], iteration_bounds = array<i64: 1, 1>, scalar_prefetch = 0 : i64, scratch_operands = 0 : i64, tpu.core_type = #tpu.core_type<tc>, window_params = [{transform_indices = @transform_0, window_bounds = array<i64: 8, 256>}, {transform_indices = @transform_1, window_bounds = array<i64: 256, 128>}, {pipeline_mode = #tpu.pipeline_mode<synchronous>, transform_indices = @transform_2, window_bounds = array<i64: 1, 128>}, {transform_indices = @transform_3, window_bounds = array<i64: 8, 128>}]} {
    %c0 = arith.constant 0 : index
    %c0_0 = arith.constant 0 : index
    %0 = vector.load %arg2[%c0, %c0_0] : memref<8x256xbf16, #tpu.memory_space<vmem>>, vector<8x256xbf16>
    %c0_1 = arith.constant 0 : index
    %c0_2 = arith.constant 0 : index
    %1 = vector.load %arg3[%c0_1, %c0_2] : memref<256x128xbf16, #tpu.memory_space<vmem>>, vector<256x128xbf16>
    %cst = arith.constant dense<0.000000e+00> : vector<8x128xf32>
    %2 = tpu.matmul %0, %1, %cst {dimension_numbers = #tpu.dot_dimension_numbers<[1], [0], [0], [1], [0, 0, 1, 1], [], []>} : vector<8x256xbf16>, vector<256x128xbf16>, vector<8x128xf32> -> vector<8x128xf32>
    %c0_i32 = arith.constant 0 : i32
    %3 = arith.cmpi eq, %arg1, %c0_i32 : i32
    %4 = arith.extui %3 : i1 to i32
    %c0_i32_3 = arith.constant 0 : i32
    %5 = arith.cmpi ne, %4, %c0_i32_3 : i32
    scf.if %5 {
      %c0_6 = arith.constant 0 : index
      %c0_7 = arith.constant 0 : index
      %9 = vector.load %arg4[%c0_6, %c0_7] : memref<1x128xf32, #tpu.memory_space<vmem>>, vector<1x128xf32>
      %10 = vector.broadcast %9 : vector<1x128xf32> to vector<8x128xf32>
      %11 = arith.addf %2, %10 : vector<8x128xf32>
      %c0_8 = arith.constant 0 : index
      %c0_9 = arith.constant 0 : index
      %12 = vector.load %arg5[%c0_8, %c0_9] : memref<8x128xf32, #tpu.memory_space<vmem>>, vector<8x128xf32>
      tpu.vector_store %arg5[%c0_8, %c0_9], %11 {strides = array<i32>} : memref<8x128xf32, #tpu.memory_space<vmem>>, vector<8x128xf32>,
    } else {
    }
    %c0_i32_4 = arith.constant 0 : i32
    %6 = arith.cmpi ne, %arg1, %c0_i32_4 : i32
    %7 = arith.extui %6 : i1 to i32
    %c0_i32_5 = arith.constant 0 : i32
    %8 = arith.cmpi ne, %7, %c0_i32_5 : i32
    scf.if %8 {
      %c0_6 = arith.constant 0 : index
      %c0_7 = arith.constant 0 : index
      %9 = vector.load %arg5[%c0_6, %c0_7] : memref<8x128xf32, #tpu.memory_space<vmem>>, vector<8x128xf32>
      %10 = arith.addf %9, %2 : vector<8x128xf32>
      %c0_8 = arith.constant 0 : index
      %c0_9 = arith.constant 0 : index
      %11 = vector.load %arg5[%c0_8, %c0_9] : memref<8x128xf32, #tpu.memory_space<vmem>>, vector<8x128xf32>
      tpu.vector_store %arg5[%c0_8, %c0_9], %10 {strides = array<i32>} : memref<8x128xf32, #tpu.memory_space<vmem>>, vector<8x128xf32>,
    } else {
    }
    return
  }
  func.func @transform_0(%arg0: i32, %arg1: i32) -> (i32, i32) {
    %c0_i32 = arith.constant 0 : i32
    return %arg0, %arg1 : i32, i32
  }
  func.func @transform_1(%arg0: i32, %arg1: i32) -> (i32, i32) {
    %c0_i32 = arith.constant 0 : i32
    %c0_i32_0 = arith.constant 0 : i32
    return %arg1, %c0_i32 : i32, i32
  }
  func.func @transform_2(%arg0: i32, %arg1: i32) -> (i32, i32) {
    %c0_i32 = arith.constant 0 : i32
    %c0_i32_0 = arith.constant 0 : i32
    %c0_i32_1 = arith.constant 0 : i32
    return %c0_i32, %c0_i32_0 : i32, i32
  }
  func.func @transform_3(%arg0: i32, %arg1: i32) -> (i32, i32) {
    %c0_i32 = arith.constant 0 : i32
    %c0_i32_0 = arith.constant 0 : i32
    return %arg0, %c0_i32 : i32, i32
  }
}

module attributes {stable_mosaic.version = 11 : i64} {
  func.func @_matmul_bias_kernel(%arg0: i32, %arg1: i32, %arg2: memref<224x64xbf16, #tpu.memory_space<vmem>>, %arg3: memref<64x16xbf16, #tpu.memory_space<vmem>>, %arg4: memref<1x16xf32, #tpu.memory_space<vmem>>, %arg5: memref<224x16xf32, #tpu.memory_space<vmem>>) attributes {dimension_semantics = [#tpu.dimension_semantics<parallel>, #tpu.dimension_semantics<arbitrary>], iteration_bounds = array<i64: 7, 1>, scalar_prefetch = 0 : i64, scratch_operands = 0 : i64, tpu.core_type = #tpu.core_type<tc>, window_params = [{transform_indices = @transform_0, window_bounds = array<i64: 224, 64>}, {transform_indices = @transform_1, window_bounds = array<i64: 64, 16>}, {pipeline_mode = #tpu.pipeline_mode<synchronous>, transform_indices = @transform_2, window_bounds = array<i64: 1, 16>}, {transform_indices = @transform_3, window_bounds = array<i64: 224, 16>}]} {
    %c0 = arith.constant 0 : index
    %c0_0 = arith.constant 0 : index
    %0 = vector.load %arg2[%c0, %c0_0] : memref<224x64xbf16, #tpu.memory_space<vmem>>, vector<224x64xbf16>
    %c0_1 = arith.constant 0 : index
    %c0_2 = arith.constant 0 : index
    %1 = vector.load %arg3[%c0_1, %c0_2] : memref<64x16xbf16, #tpu.memory_space<vmem>>, vector<64x16xbf16>
    %cst = arith.constant dense<0.000000e+00> : vector<224x16xf32>
    %2 = tpu.matmul %0, %1, %cst {dimension_numbers = #tpu.dot_dimension_numbers<[1], [0], [0], [1], [0, 0, 1, 1], [], []>} : vector<224x64xbf16>, vector<64x16xbf16>, vector<224x16xf32> -> vector<224x16xf32>
    %c0_i32 = arith.constant 0 : i32
    %3 = arith.cmpi eq, %arg1, %c0_i32 : i32
    %4 = arith.extui %3 : i1 to i32
    %c0_i32_3 = arith.constant 0 : i32
    %5 = arith.cmpi ne, %4, %c0_i32_3 : i32
    scf.if %5 {
      %c0_6 = arith.constant 0 : index
      %c0_7 = arith.constant 0 : index
      %9 = vector.load %arg4[%c0_6, %c0_7] : memref<1x16xf32, #tpu.memory_space<vmem>>, vector<1x16xf32>
      %10 = vector.broadcast %9 : vector<1x16xf32> to vector<224x16xf32>
      %11 = arith.addf %2, %10 : vector<224x16xf32>
      %c0_8 = arith.constant 0 : index
      %c0_9 = arith.constant 0 : index
      %12 = vector.load %arg5[%c0_8, %c0_9] : memref<224x16xf32, #tpu.memory_space<vmem>>, vector<224x16xf32>
      tpu.vector_store %arg5[%c0_8, %c0_9], %11 {strides = array<i32>} : memref<224x16xf32, #tpu.memory_space<vmem>>, vector<224x16xf32>,
    } else {
    }
    %c0_i32_4 = arith.constant 0 : i32
    %6 = arith.cmpi ne, %arg1, %c0_i32_4 : i32
    %7 = arith.extui %6 : i1 to i32
    %c0_i32_5 = arith.constant 0 : i32
    %8 = arith.cmpi ne, %7, %c0_i32_5 : i32
    scf.if %8 {
      %c0_6 = arith.constant 0 : index
      %c0_7 = arith.constant 0 : index
      %9 = vector.load %arg5[%c0_6, %c0_7] : memref<224x16xf32, #tpu.memory_space<vmem>>, vector<224x16xf32>
      %10 = arith.addf %9, %2 : vector<224x16xf32>
      %c0_8 = arith.constant 0 : index
      %c0_9 = arith.constant 0 : index
      %11 = vector.load %arg5[%c0_8, %c0_9] : memref<224x16xf32, #tpu.memory_space<vmem>>, vector<224x16xf32>
      tpu.vector_store %arg5[%c0_8, %c0_9], %10 {strides = array<i32>} : memref<224x16xf32, #tpu.memory_space<vmem>>, vector<224x16xf32>,
    } else {
    }
    return
  }
  func.func @transform_0(%arg0: i32, %arg1: i32) -> (i32, i32) {
    %c0_i32 = arith.constant 0 : i32
    return %arg0, %arg1 : i32, i32
  }
  func.func @transform_1(%arg0: i32, %arg1: i32) -> (i32, i32) {
    %c0_i32 = arith.constant 0 : i32
    %c0_i32_0 = arith.constant 0 : i32
    return %arg1, %c0_i32 : i32, i32
  }
  func.func @transform_2(%arg0: i32, %arg1: i32) -> (i32, i32) {
    %c0_i32 = arith.constant 0 : i32
    %c0_i32_0 = arith.constant 0 : i32
    %c0_i32_1 = arith.constant 0 : i32
    return %c0_i32, %c0_i32_0 : i32, i32
  }
  func.func @transform_3(%arg0: i32, %arg1: i32) -> (i32, i32) {
    %c0_i32 = arith.constant 0 : i32
    %c0_i32_0 = arith.constant 0 : i32
    return %arg0, %c0_i32 : i32, i32
  }
}

</mosaic_0001>

<bundles_post_ra>
// kernel: tiny_mask_rcnn_forward.5
= control target key start
LH: loop header
LB: loop body
LE: loop exit
PB: predicated region body
PF: predicated region fallthrough
CT: control target
= control target key end

     0   :  { %8 = vsyncpa [#allocation3], 0  ;;  %s805_s12 = smov [#allocation2]   ;;  %s1006_s0 = inlined_call_operand.vmem [shape: bf16[16,768], index: 0, kind: input, shape index: {}]   ;;  %s1007_s1 = inlined_call_operand.vmem [shape: bf16[768,64], index: 1, kind: input, shape index: {}]   ;;  %s1008_s2 = inlined_call_operand.hbm [shape: f32[1,64], index: 2, kind: input, shape index: {}]   ;;  %s1009_s3 = inlined_call_operand.vmem [shape: f32[16,64], index: 3, kind: output, shape index: {}]  }
   0x1   :  { %s19_s13 = sshll.u32 %s805_s12, 4  ;;  %s781_s16 = scalar_lea.hbm %s1008_s2, 16  ;;  %s20_s13 = int_to_ptr.vmem [resolvable:$true] %s19_s13 }
   0x2   :  { %p782_p0 = scmp.ne.s32.totalorder %s1008_s2, %s781_s16  ;;  %p785_p1 = scmp.lt.u32.totalorder %s781_s16, %s1008_s2 }
   0x4   :  { %p787_p2 = pnand %p785_p1, %p782_p0 }
   0x6   :  { %790 = shalt.err (!%p787_p2)
}
   0x7   :  { %s791_s21 = scalar_lea.vmem %s20_s13, 16  ;;  %s795_s22 = scalar_lea.vmem %s20_s13, 32 }
   0x8   :  { %p792_p3 = scmp.ne.s32.totalorder %s20_s13, %s791_s21  ;;  %p796_p4 = scmp.lt.s32.totalorder %s20_s13, %s20_s13 }
   0x9   :  { %p797_p5 = scmp.lt.s32.totalorder %s795_s22, %s791_s21 }
   0xb   :  { %p798_p6 = por %p797_p5, %p796_p4 }
   0xd   :  { %p799_p7 = pnand %p798_p6, %p792_p3 }
   0xf   :  { %802 = shalt.err (!%p799_p7)
}
  0x10   :  { %22 = dma.hbm_to_vmem [thread:$0]  %s1008_s2, 16, %s20_s13, [#allocation3]  }
  0x11   :  { %803 = dma.done.wait [#allocation3], 16  }
  0x12   :  { %804 = vsyncadd [#allocation3], 4294967280  ;;  %v724_v0 = vld [vmem:[%s1007_s1 + $0x40] sm:$0xff]   ;;  %v728_v4 = vld [vmem:[%s1007_s1 + $0x48] sm:$0xff]   ;;  %vm583_vm0 = vcmask 523264  }
  0x13   :  { %v725_v1 = vld [vmem:[%s1007_s1 + $0xc0] sm:$0xff]   ;;  %657 = vmatprep.subr.bf16.mxu0 %v724_v0  ;;  %v729_v5 = vld [vmem:[%s1007_s1 + $0xc8] sm:$0xff]   ;;  %v732_v8 = vld [vmem:[%s1007_s1 + $0x50] sm:$0xff]  }
  0x14   :  { %v726_v2 = vld [vmem:[%s1007_s1] sm:$0xff]   ;;  %679 = vmatprep.subr.bf16.mxu1 %v725_v1  ;;  %v730_v6 = vld [vmem:[%s1007_s1 + $0x8] sm:$0xff]   ;;  %v733_v9 = vld [vmem:[%s1007_s1 + $0xd0] sm:$0xff]  }
  0x15   :  { %v727_v3 = vld [vmem:[%s1007_s1 + $0x80] sm:$0xff]   ;;  %658 = vmatpush3.bf16.msra.mxu0 %v726_v2  ;;  %v731_v7 = vld [vmem:[%s1007_s1 + $0x88] sm:$0xff]   ;;  %v734_v10 = vld [vmem:[%s1007_s1 + $0x10] sm:$0xff]  }
  0x16   :  { %680 = vmatpush3.bf16.msra.mxu1 %v727_v3  ;;  %659 = vmatprep.subr.bf16.mxu0 %v728_v4  ;;  %v735_v11 = vld [vmem:[%s1007_s1 + $0x90] sm:$0xff]   ;;  %v736_v12 = vld [vmem:[%s1007_s1 + $0x58] sm:$0xff]   ;;  %v740_v16 = vld [vmem:[%s1007_s1 + $0x60] sm:$0xff]  }
  0x17   :  { %681 = vmatprep.subr.bf16.mxu1 %v729_v5  ;;  %v737_v13 = vld [vmem:[%s1007_s1 + $0xd8] sm:$0xff]   ;;  %v741_v17 = vld [vmem:[%s1007_s1 + $0xe0] sm:$0xff]   ;;  %v744_v20 = vld [vmem:[%s1007_s1 + $0x68] sm:$0xff]  }
  0x18   :  { %v738_v14 = vld [vmem:[%s1007_s1 + $0x18] sm:$0xff]   ;;  %v742_v18 = vld [vmem:[%s1007_s1 + $0x20] sm:$0xff]   ;;  %v745_v21 = vld [vmem:[%s1007_s1 + $0xe8] sm:$0xff]  }
  0x19   :  { %660 = vmatpush3.bf16.msra.mxu0 %v730_v6  ;;  %v739_v15 = vld [vmem:[%s1007_s1 + $0x98] sm:$0xff]   ;;  %v743_v19 = vld [vmem:[%s1007_s1 + $0xa0] sm:$0xff]   ;;  %v746_v22 = vld [vmem:[%s1007_s1 + $0x28] sm:$0xff]  }
  0x1a   :  { %682 = vmatpush3.bf16.msra.mxu1 %v731_v7  ;;  %661 = vmatprep.subr.bf16.mxu0 %v732_v8  ;;  %v747_v23 = vld [vmem:[%s1007_s1 + $0xa8] sm:$0xff]   ;;  %v748_v24 = vld [vmem:[%s1007_s1 + $0x70] sm:$0xff]   ;;  %v752_v28 = vld [vmem:[%s1007_s1 + $0x78] sm:$0xff]  }
  0x1b   :  { %683 = vmatprep.subr.bf16.mxu1 %v733_v9  ;;  %v749_v25 = vld [vmem:[%s1007_s1 + $0xf0] sm:$0xff]   ;;  %v753_v29 = vld [vmem:[%s1007_s1 + $0xf8] sm:$0xff]   ;;  %v759_v34 = vld [vmem:[%s1006_s0 + $0x8] ss:$24 sps:$4 sm:$0xff]  }
  0x1c   :  { %v750_v26 = vld [vmem:[%s1007_s1 + $0x30] sm:$0xff]   ;;  %v754_v30 = vld [vmem:[%s1007_s1 + $0x38] sm:$0xff]   ;;  %v761_v35 = vld [vmem:[%s1006_s0 + $0xc] ss:$24 sps:$4 sm:$0xff]  }
  0x1d   :  { %662 = vmatpush3.bf16.msra.mxu0 %v734_v10  ;;  %v751_v27 = vld [vmem:[%s1007_s1 + $0xb0] sm:$0xff]   ;;  %v755_v31 = vld [vmem:[%s1007_s1 + $0xb8] sm:$0xff]   ;;  %v762_v36 = vld [vmem:[%s1007_s1 + $0x140] sm:$0xff]   ;;  %520 = vmatprep.mubr.bf16.mxu1 %v761_v35 }
  0x1e   :  { %684 = vmatpush3.bf16.msra.mxu1 %v735_v11  ;;  %663 = vmatprep.subr.bf16.mxu0 %v736_v12  ;;  %v756_v32 = vld [vmem:[%s1006_s0] ss:$24 sps:$4 sm:$0xff]   ;;  %v758_v33 = vld [vmem:[%s1006_s0 + $0x4] ss:$24 sps:$4 sm:$0xff]   ;;  %v764_v38 = vld [vmem:[%s1007_s1 + $0x148] sm:$0xff]  }
  0x1f   :  { %685 = vmatprep.subr.bf16.mxu1 %v737_v13  ;;  %479 = vmatprep.mubr.bf16.mxu0 %v758_v33  ;;  %v763_v37 = vld [vmem:[%s1007_s1 + $0x100] sm:$0xff]   ;;  %v765_v39 = vld [vmem:[%s1007_s1 + $0x108] sm:$0xff]   ;;  %v766_v40 = vld [vmem:[%s1007_s1 + $0x150] sm:$0xff]  }
  0x20   :  { %v767_v41 = vld [vmem:[%s1007_s1 + $0x110] sm:$0xff]   ;;  %v768_v42 = vld [vmem:[%s1007_s1 + $0x158] sm:$0xff]   ;;  %v770_v44 = vld [vmem:[%s1007_s1 + $0x160] sm:$0xff]  }
  0x21   :  { %664 = vmatpush3.bf16.msra.mxu0 %v738_v14  ;;  %v769_v43 = vld [vmem:[%s1007_s1 + $0x118] sm:$0xff]   ;;  %v771_v45 = vld [vmem:[%s1007_s1 + $0x120] sm:$0xff]   ;;  %v772_v46 = vld [vmem:[%s1007_s1 + $0x168] sm:$0xff]  }
  0x22   :  { %686 = vmatpush3.bf16.msra.mxu1 %v739_v15  ;;  %665 = vmatprep.subr.bf16.mxu0 %v740_v16  ;;  %v780_v47 = vld [vmem:[%s1006_s0 + $0x14] ss:$24 sps:$4 sm:$0xff]   ;;  %v776_v51 = vld [vmem:[%s1007_s1 + $0x178] sm:$0xff]   ;;  %v778_v53 = vld [vmem:[%s1006_s0 + $0x10] ss:$24 sps:$4 sm:$0xff]  }
  0x23   :  { %687 = vmatprep.subr.bf16.mxu1 %v741_v17  ;;  %v773_v48 = vld [vmem:[%s1007_s1 + $0x128] sm:$0xff]   ;;  %v774_v49 = vld [vmem:[%s1007_s1 + $0x170] sm:$0xff]   ;;  %v777_v52 = vld [vmem:[%s1007_s1 + $0x138] sm:$0xff]  }
  0x24   :  { %v775_v50 = vld [vmem:[%s1007_s1 + $0x130] sm:$0xff]   ;;  %v656_v8 = vld [vmem:[#allocation2] ss:$0 sm:$0xff] }
  0x25   :  { %666 = vmatpush3.bf16.msra.mxu0 %v742_v18 }
  0x26   :  { %688 = vmatpush3.bf16.msra.mxu1 %v743_v19  ;;  %667 = vmatprep.subr.bf16.mxu0 %v744_v20 }
  0x27   :  { %689 = vmatprep.subr.bf16.mxu1 %v745_v21 }
  0x29   :  { %668 = vmatpush3.bf16.msra.mxu0 %v746_v22 }
  0x2a   :  { %690 = vmatpush3.bf16.msra.mxu1 %v747_v23  ;;  %669 = vmatprep.subr.bf16.mxu0 %v748_v24 }
  0x2b   :  { %691 = vmatprep.subr.bf16.mxu1 %v749_v25 }
  0x2d   :  { %670 = vmatpush3.bf16.msra.mxu0 %v750_v26 }
  0x2e   :  { %692 = vmatpush3.bf16.msra.mxu1 %v751_v27  ;;  %671 = vmatprep.subr.bf16.mxu0 %v752_v28 }
  0x2f   :  { %693 = vmatprep.subr.bf16.mxu1 %v753_v29 }
  0x31   :  { %672 = vmatpush3.bf16.msra.mxu0 %v754_v30 }
  0x32   :  { %694 = vmatpush3.bf16.msra.mxu1 %v755_v31  ;;  %701 = vmatprep.subr.bf16.mxu0 %v762_v36 }
  0x34   :  { %480 = vmatmul.mubr.bf16.vlgmr.msra.gmra.mrb[0].mxu0 %v756_v32 }
  0x35   :  { %521 = vmatmul.mubr.bf16.vlgmr.msra.gmra.mrb[0].mxu1 %v759_v34  ;;  %702 = vmatpush3.bf16.msra.mxu0 %v763_v37 }
  0x36   :  { %703 = vmatprep.subr.bf16.mxu0 %v764_v38  ;;  %561 = vmatprep.mubr.bf16.mxu0 %v780_v47 }
  0x39   :  { %704 = vmatpush3.bf16.msra.mxu0 %v765_v39 }
  0x3a   :  { %705 = vmatprep.subr.bf16.mxu0 %v766_v40 }
  0x3d   :  { %706 = vmatpush3.bf16.msra.mxu0 %v767_v41 }
  0x3e   :  { %707 = vmatprep.subr.bf16.mxu0 %v768_v42 }
  0x41   :  { %708 = vmatpush3.bf16.msra.mxu0 %v769_v43 }
  0x42   :  { %709 = vmatprep.subr.bf16.mxu0 %v770_v44 }
  0x45   :  { %710 = vmatpush3.bf16.msra.mxu0 %v771_v45 }
  0x46   :  { %711 = vmatprep.subr.bf16.mxu0 %v772_v46 }
  0x49   :  { %712 = vmatpush3.bf16.msra.mxu0 %v773_v48 }
  0x4a   :  { %713 = vmatprep.subr.bf16.mxu0 %v774_v49 }
  0x4d   :  { %714 = vmatpush3.bf16.msra.mxu0 %v775_v50 }
  0x4e   :  { %715 = vmatprep.subr.bf16.mxu0 %v776_v51 }
  0x51   :  { %716 = vmatpush3.bf16.msra.mxu0 %v777_v52 }
  0x54   :  { %562 = vmatmul.mubr.bf16.vlgmr.msra.gmra.mrb[4].mxu0 %v778_v53 }
 0x107   :  { %v673_v54 = vpop.f32.mrb[0].mxu0 }
 0x108   :  { %v695_v55 = vpop.f32.mrb[0].mxu1  ;;  %v674_v56 = vpop.f32.mrb[1].mxu0 }
 0x109   :  { %v675_v57 = vadd.f32 %v674_v56, %v673_v54  ;;  %v696_v58 = vpop.f32.mrb[1].mxu1  ;;  %v676_v59 = vpop.f32.mrb[2].mxu0 }
 0x10a   :  { %v697_v60 = vadd.f32 %v696_v58, %v695_v55  ;;  %v698_v61 = vpop.f32.mrb[2].mxu1  ;;  %v677_v62 = vpop.f32.mrb[3].mxu0 }
 0x10b   :  { %v678_v63 = vadd.f32 %v677_v62, %v676_v59  ;;  %v699_v0 = vpop.f32.mrb[3].mxu1 }
 0x10c   :  { %v523_v1 = vadd.f32 %v697_v60, %v675_v57  ;;  %v700_v2 = vadd.f32 %v699_v0, %v698_v61 }
 0x10e   :  { %v526_v3 = vadd.f32 %v700_v2, %v678_v63 }
 0x127   :  { %v717_v4 = vpop.f32.mrb[4].mxu0 }
 0x128   :  { %v718_v5 = vpop.f32.mrb[5].mxu0 }
 0x129   :  { %v719_v6 = vadd.f32 %v718_v5, %v717_v4  ;;  %v720_v7 = vpop.f32.mrb[6].mxu0 }
 0x12a   :  { %v721_v9 = vpop.f32.mrb[7].mxu0 }
 0x12b   :  { %v564_v10 = vadd.f32 %v719_v6, %v523_v1  ;;  %v722_v11 = vadd.f32 %v721_v9, %v720_v7 }
 0x12d   :  { %v581_v12 = vadd.f32 %v656_v8, %v564_v10  ;;  %v567_v13 = vadd.f32 %v722_v11, %v526_v3 }
 0x12f   :  { %584 = vst.msk [vmem:[%s1009_s3] sm:$0xff] %vm583_vm0, %v581_v12  ;;  %v582_v14 = vadd.f32 %v656_v8, %v567_v13 }
 0x131   :  { %585 = vst.msk [vmem:[%s1009_s3 + $0x8] sm:$0xff] %vm583_vm0, %v582_v14 }
 0x132   :  { %601 = vsyncpa [#allocation3], 1 }

// kernel: tiny_mask_rcnn_forward.6
= control target key start
LH: loop header
LB: loop body
LE: loop exit
PB: predicated region body
PF: predicated region fallthrough
CT: control target
= control target key end

     0   :  { %s347_s0 = inlined_call_operand.vmem [shape: s32[6272], index: 0, kind: input, shape index: {}]   ;;  %s348_s2 = inlined_call_operand.vmem [shape: f32[16,64], index: 2, kind: input, shape index: {}]   ;;  %s349_s3 = inlined_call_operand.vmem [shape: f32[8,196,64], index: 3, kind: output, shape index: {}]   ;;  %s350_s1 = inlined_call_operand.vmem [shape: f32[6272], index: 1, kind: input, shape index: {}]  }
   0x1   :  { %s8_s14 = sshll.u32 %s347_s0, 4  ;;  %s12_s17 = sshll.u32 %s350_s1, 4  ;;  %s9_s14 = int_to_ptr.vmem [resolvable:$true] %s8_s14  ;;  %s13_s17 = int_to_ptr.vmem [resolvable:$true] %s12_s17 }
   0x2   :  { %s231_s18 = scalar_lea.vmem %s9_s14, 784  ;;  %s235_s19 = scalar_lea.vmem %s9_s14, 896 }
   0x3   :  { %p232_p0 = scmp.ne.s32.totalorder %s9_s14, %s231_s18  ;;  %p236_p1 = scmp.lt.s32.totalorder %s9_s14, %s9_s14 }
   0x4   :  { %p237_p2 = scmp.lt.s32.totalorder %s235_s19, %s231_s18 }
   0x6   :  { %p238_p3 = por %p237_p2, %p236_p1 }
   0x8   :  { %p239_p4 = pnand %p238_p3, %p232_p0 }
   0xa   :  { %242 = shalt.err (!%p239_p4)  }
   0xb   :  { %s273_s20 = smov [#allocation3]   ;;  %s243_s21 = scalar_lea.vmem %s13_s17, 784 }
   0xc   :  { %11 = dma.vmem_to_smem %s9_s14, 784, %s273_s20, [#allocation2] }
   0xd   :  { %p244_p5 = scmp.ne.s32.totalorder %s13_s17, %s243_s21  ;;  %s247_s22 = scalar_lea.vmem %s13_s17, 896 }
   0xe   :  { %p248_p6 = scmp.lt.s32.totalorder %s13_s17, %s13_s17  ;;  %p249_p7 = scmp.lt.s32.totalorder %s247_s22, %s243_s21 }
  0x10   :  { %p250_p8 = por %p249_p7, %p248_p6 }
  0x12   :  { %p251_p9 = pnand %p250_p8, %p244_p5 }
  0x14   :  { %254 = shalt.err (!%p251_p9)  }
  0x15   :  { %s274_s0 = smov [#allocation4]  }
  0x16   :  { %15 = dma.vmem_to_smem %s13_s17, 784, %s274_s0, [#allocation2] }
  0x17   :  { %263 = dma.done.wait [#allocation2], 1568 }
  0x18   :  { %264 = vsyncadd [#allocation2], 4294965728 }
  0x19   :  { %17 = sfence }
  0x1a   :  { %s301_s1 = smov 0  }
  0x1b LB: > { %s307_s23 = sadd.s32 4294967295, %s267_s1   ;;  %p207_p10 = scmp.ge.s32.totalorder %s267_s1, 1  ;;  %s267_s1 = sphi %s301_s1, %s23_s1  }
  0x1c   : > { %p89_p11 = scmp.lt.s32.totalorder %s267_s1, 9 }
  0x1e   : > { %p90_p12 = pnand %p207_p10, %p89_p11 }
  0x1f   : > { %p104_p13 = scmp.lt.s32.totalorder (!%p90_p12), %s307_s23, 7  ;;  %s109_s24 = smul.u32 (!%p90_p12), 784, %s307_s23 }
  0x20   : > { %93 = sbr.rel (%p90_p12) target bundleno = 66 (0x42), region = 24  ;;  %s319_s30 = smov (!%p90_p12), 0  }
  0x27   : > { %s105_s25 = scalar_select %p104_p13, %s307_s23, 7 }
  0x29   : > { %s212_s26 = smul.u32 200, %s105_s25 }
  0x2b   : > { %s317_s29 = scalar_lea.vmem %s349_s3, %s212_s26 }
  0x2c LB: >> { %s209_s4 = sshll.u32 %s271_s30, 2  ;;  %vm149_vm0 = vcmask 516096   ;;  %s271_s30 = sphi %s319_s30, %s115_s30  }
  0x2d   : >> { %s117_s5 = sadd.s32 %s209_s4, %s109_s24 }
  0x2e   : >> { %s118_s6 = sld [smem:[#allocation4 + %s117_s5]]  ;;  %s124_s8 = sadd.s32 1, %s117_s5 }
  0x2f   : >> { %s119_s7 = sld [smem:[#allocation3 + %s117_s5]]  ;;  %s132_s9 = sadd.s32 2, %s117_s5 }
  0x30   : >> { %s125_s10 = sld [smem:[#allocation4 + %s124_s8]]  ;;  %s140_s14 = sadd.s32 3, %s117_s5 }
  0x31   : >> { %s126_s11 = sld [smem:[#allocation3 + %s124_s8]]  ;;  %s148_s5 = scalar_lea.vmem %s317_s29, %s271_s30 }
  0x32   : >> { %s133_s12 = sld [smem:[#allocation4 + %s132_s9]]  ;;  %s115_s30 = sadd.s32 1, %s271_s30  }
  0x33   : >> { %s134_s13 = sld [smem:[#allocation3 + %s132_s9]]  ;;  %p112_p0 = scmp.ge.s32.totalorder %s115_s30, 196  }
  0x34   : >> { %s141_s15 = sld [smem:[#allocation4 + %s140_s14]]  ;;  %v122_v0 = vstv %s118_s6 }
  0x35   : >> { %s142_s16 = sld [smem:[#allocation3 + %s140_s14]]  ;;  %s120_s19 = scalar_lea.vmem %s348_s2, %s119_s7 }
  0x36   : >> { %v121_v1 = vld [vmem:[%s120_s19] sm:$0x1]  ;;  %v129_v3 = vstv %s125_s10 }
  0x37   : >> { %v123_v2 = vmul.f32 %v122_v0, %v121_v1  ;;  %s127_s22 = scalar_lea.vmem %s348_s2, %s126_s11 }
  0x38   : >> { %v128_v4 = vld [vmem:[%s127_s22] sm:$0x1]  ;;  %v137_v5 = vstv %s133_s12 }
  0x39   : >> { %s135_s26 = scalar_lea.vmem %s348_s2, %s134_s13  ;;  %v130_v6 = vmul.f32 %v129_v3, %v128_v4 }
  0x3a   : >> { %v136_v7 = vld [vmem:[%s135_s26] sm:$0x1]  ;;  %v145_v9 = vstv %s141_s15 }
  0x3b   : >> { %v138_v8 = vmul.f32 %v137_v5, %v136_v7  ;;  %s143_s4 = scalar_lea.vmem %s348_s2, %s142_s16  ;;  %v131_v10 = vadd.f32 %v130_v6, %v123_v2  ;;  %114 = sbr.rel (!%p112_p0) target bundleno = 44 (0x2c), region = 63 }
  0x3c   : >> { %v144_v11 = vld [vmem:[%s143_s4] sm:$0x1] }
  0x3d   : >> { %v146_v12 = vmul.f32 %v145_v9, %v144_v11  ;;  %v139_v13 = vadd.f32 %v138_v8, %v131_v10 }
  0x3f   : >> { %v147_v14 = vadd.f32 %v146_v12, %v139_v13 }
  0x41   : >> { %150 = vst.msk [vmem:[%s148_s5] sm:$0x1] %vm149_vm0, %v147_v14 }
  0x42 PF: > { %s23_s1 = sadd.s32 1, %s267_s1  }
  0x43   : > { %p20_p1 = scmp.ge.s32.totalorder %s23_s1, 10  }
  0x45   :  { %22 = sbr.rel (!%p20_p1) target bundleno = 27 (0x1b), region = 74 }

// kernel: tiny_mask_rcnn_forward.7
= control target key start
LH: loop header
LB: loop body
LE: loop exit
PB: predicated region body
PF: predicated region fallthrough
CT: control target
= control target key end

     0   :  { %s2711_s12 = smov 0   ;;  %s2713_s13 = smov 0   ;;  %s3036_s0 = inlined_call_operand.vmem [shape: bf16[8,12544], index: 0, kind: input, shape index: {}]   ;;  %s3037_s1 = inlined_call_operand.vmem [shape: bf16[12544,256], index: 1, kind: input, shape index: {}]   ;;  %s3038_s2 = inlined_call_operand.vmem [shape: f32[1,256], index: 2, kind: input, shape index: {}]   ;;  %s3039_s3 = inlined_call_operand.vmem [shape: f32[8,256], index: 3, kind: output, shape index: {}]  }
   0x1   :  { %s2715_s14 = smov 0  }
   0x2 LB: > { %s22_s15 = sadd.s32 1, %s2685_s13  ;;  %p2023_p0 = scmp.ge.s32.totalorder %s2689_s14, 1  ;;  %s2689_s14 = sphi %s2715_s14, %s13_s14   ;;  %s2685_s13 = sphi %s2713_s13, %s3041_s13   ;;  %s2681_s12 = sphi %s2711_s12, %s3040_s12  }
   0x3   : > { %p23_p1 = scmp.ge.s32.totalorder %s22_s15, 7  ;;  %p168_p2 = scmp.lt.s32.totalorder %s2689_s14, 8 }
   0x5   : > { %s3043_s15 = smov (%p23_p1, %s22_s15), 0  ;;  %p169_p3 = pnand %p2023_p0, %p168_p2 }
   0x6   : > { %s212_s16 = smul.u32 (!%p169_p3), 224, %s2681_s12  ;;  %p2265_p6 = scmp.ne.s32.totalorder (!%p169_p3), %s2681_s12, 0 }
   0x7   : > { %172 = sbr.rel (%p169_p3) target bundleno = 503 (0x1f7), region = 32 }
   0x8   : > { %p213_p4 = scmp.lt.s32.totalorder (!%p169_p3), %s212_s16, 1567  ;;  %s202_s21 = smul.u32 (!%p169_p3), 14, %s2681_s12 }
   0xa   : > { %p205_p5 = scmp.lt.s32.totalorder (!%p169_p3), %s202_s21, 97 }
   0xe   : > { %s3045_s16 = smov (!%p213_p4, %s212_s16), 1567  ;;  %s3047_s21 = smov (!%p205_p5, %s202_s21), 97 }
   0xf   : > { %s2270_s17 = sshll.u32 %s3045_s16, 3  ;;  %s2024_s22 = sshll.u32 %s3047_s21, 2 }
  0x10   : > { %s2735_s20 = scalar_lea.vmem %s3037_s1, %s2270_s17  ;;  %s2785_s25 = scalar_lea.vmem %s3036_s0, %s2024_s22 }
  0x11   : > { %v2317_v0 = vld [vmem:[%s2735_s20 + $0x4] ss:$8 sps:$4 sm:$0xff]   ;;  %v2321_v2 = vld [vmem:[%s2735_s20] ss:$8 sps:$4 sm:$0xff]   ;;  %v2323_v4 = vld [vmem:[%s2735_s20 + $0x14] ss:$8 sps:$4 sm:$0xff]  }
  0x12   : > { %v2319_v1 = vld [vmem:[%s2735_s20 + $0x304] ss:$8 sps:$4 sm:$0xff]   ;;  %1624 = vmatprep.subr.bf16.mxu1 %v2317_v0  ;;  %v2322_v3 = vld [vmem:[%s2735_s20 + $0x300] ss:$8 sps:$4 sm:$0xff]   ;;  %v2325_v5 = vld [vmem:[%s2735_s20 + $0x314] ss:$8 sps:$4 sm:$0xff]  }
  0x13   : > { %1747 = vmatprep.subr.bf16.mxu0 %v2319_v1  ;;  %1625 = vmatpush1.bf16.msra.mxu1 %v2321_v2  ;;  %v2327_v6 = vld [vmem:[%s2735_s20 + $0x10] ss:$8 sps:$4 sm:$0xff]   ;;  %v2329_v8 = vld [vmem:[%s2735_s20 + $0x24] ss:$8 sps:$4 sm:$0xff]   ;;  %v2333_v10 = vld [vmem:[%s2735_s20 + $0x20] ss:$8 sps:$4 sm:$0xff]  }
  0x14   : > { %1748 = vmatpush1.bf16.msra.mxu0 %v2322_v3  ;;  %1626 = vmatprep.subr.bf16.mxu1 %v2323_v4  ;;  %v2328_v7 = vld [vmem:[%s2735_s20 + $0x310] ss:$8 sps:$4 sm:$0xff]   ;;  %v2331_v9 = vld [vmem:[%s2735_s20 + $0x324] ss:$8 sps:$4 sm:$0xff]   ;;  %v2334_v11 = vld [vmem:[%s2735_s20 + $0x320] ss:$8 sps:$4 sm:$0xff]  }
  0x15   : > { %1749 = vmatprep.subr.bf16.mxu0 %v2325_v5  ;;  %v2335_v12 = vld [vmem:[%s2735_s20 + $0x34] ss:$8 sps:$4 sm:$0xff]   ;;  %v2339_v14 = vld [vmem:[%s2735_s20 + $0x30] ss:$8 sps:$4 sm:$0xff]   ;;  %v2341_v16 = vld [vmem:[%s2735_s20 + $0x44] ss:$8 sps:$4 sm:$0xff]  }
  0x16   : > { %v2337_v13 = vld [vmem:[%s2735_s20 + $0x334] ss:$8 sps:$4 sm:$0xff]   ;;  %v2340_v15 = vld [vmem:[%s2735_s20 + $0x330] ss:$8 sps:$4 sm:$0xff]   ;;  %v2343_v17 = vld [vmem:[%s2735_s20 + $0x344] ss:$8 sps:$4 sm:$0xff]  }
  0x17   : > { %1627 = vmatpush1.bf16.msra.mxu1 %v2327_v6  ;;  %v2345_v18 = vld [vmem:[%s2735_s20 + $0x40] ss:$8 sps:$4 sm:$0xff]   ;;  %v2347_v20 = vld [vmem:[%s2735_s20 + $0x54] ss:$8 sps:$4 sm:$0xff]   ;;  %v2351_v22 = vld [vmem:[%s2735_s20 + $0x50] ss:$8 sps:$4 sm:$0xff]  }
  0x18   : > { %1750 = vmatpush1.bf16.msra.mxu0 %v2328_v7  ;;  %1628 = vmatprep.subr.bf16.mxu1 %v2329_v8  ;;  %v2346_v19 = vld [vmem:[%s2735_s20 + $0x340] ss:$8 sps:$4 sm:$0xff]   ;;  %v2349_v21 = vld [vmem:[%s2735_s20 + $0x354] ss:$8 sps:$4 sm:$0xff]   ;;  %v2352_v23 = vld [vmem:[%s2735_s20 + $0x350] ss:$8 sps:$4 sm:$0xff]  }
  0x19   : > { %1751 = vmatprep.subr.bf16.mxu0 %v2331_v9  ;;  %v2353_v24 = vld [vmem:[%s2735_s20 + $0x64] ss:$8 sps:$4 sm:$0xff]   ;;  %v2357_v26 = vld [vmem:[%s2735_s20 + $0x60] ss:$8 sps:$4 sm:$0xff]   ;;  %v2359_v28 = vld [vmem:[%s2735_s20 + $0x74] ss:$8 sps:$4 sm:$0xff]  }
  0x1a   : > { %v2355_v25 = vld [vmem:[%s2735_s20 + $0x364] ss:$8 sps:$4 sm:$0xff]   ;;  %v2358_v27 = vld [vmem:[%s2735_s20 + $0x360] ss:$8 sps:$4 sm:$0xff]   ;;  %v2361_v29 = vld [vmem:[%s2735_s20 + $0x374] ss:$8 sps:$4 sm:$0xff]  }
  0x1b   : > { %1629 = vmatpush1.bf16.msra.mxu1 %v2333_v10  ;;  %v2363_v30 = vld [vmem:[%s2735_s20 + $0x70] ss:$8 sps:$4 sm:$0xff]   ;;  %v2365_v32 = vld [vmem:[%s2735_s20 + $0x84] ss:$8 sps:$4 sm:$0xff]   ;;  %v2369_v34 = vld [vmem:[%s2735_s20 + $0x80] ss:$8 sps:$4 sm:$0xff]  }
  0x1c   : > { %1752 = vmatpush1.bf16.msra.mxu0 %v2334_v11  ;;  %1630 = vmatprep.subr.bf16.mxu1 %v2335_v12  ;;  %v2364_v31 = vld [vmem:[%s2735_s20 + $0x370] ss:$8 sps:$4 sm:$0xff]   ;;  %v2367_v33 = vld [vmem:[%s2735_s20 + $0x384] ss:$8 sps:$4 sm:$0xff]   ;;  %v2370_v35 = vld [vmem:[%s2735_s20 + $0x380] ss:$8 sps:$4 sm:$0xff]  }
  0x1d   : > { %1753 = vmatprep.subr.bf16.mxu0 %v2337_v13  ;;  %v2371_v36 = vld [vmem:[%s2735_s20 + $0x94] ss:$8 sps:$4 sm:$0xff]   ;;  %v2375_v38 = vld [vmem:[%s2735_s20 + $0x90] ss:$8 sps:$4 sm:$0xff]   ;;  %v2377_v40 = vld [vmem:[%s2735_s20 + $0xa4] ss:$8 sps:$4 sm:$0xff]  }
  0x1e   : > { %v2373_v37 = vld [vmem:[%s2735_s20 + $0x394] ss:$8 sps:$4 sm:$0xff]   ;;  %v2376_v39 = vld [vmem:[%s2735_s20 + $0x390] ss:$8 sps:$4 sm:$0xff]   ;;  %v2379_v41 = vld [vmem:[%s2735_s20 + $0x3a4] ss:$8 sps:$4 sm:$0xff]  }
  0x1f   : > { %1631 = vmatpush1.bf16.msra.mxu1 %v2339_v14  ;;  %v2381_v42 = vld [vmem:[%s2735_s20 + $0xa0] ss:$8 sps:$4 sm:$0xff]   ;;  %v2383_v44 = vld [vmem:[%s2735_s20 + $0xb4] ss:$8 sps:$4 sm:$0xff]   ;;  %v2387_v47 = vld [vmem:[%s2735_s20 + $0xb0] ss:$8 sps:$4 sm:$0xff]  }
  0x20   : > { %1754 = vmatpush1.bf16.msra.mxu0 %v2340_v15  ;;  %1632 = vmatprep.subr.bf16.mxu1 %v2341_v16  ;;  %v2382_v43 = vld [vmem:[%s2735_s20 + $0x3a0] ss:$8 sps:$4 sm:$0xff]   ;;  %v2385_v45 = vld [vmem:[%s2735_s20 + $0x3b4] ss:$8 sps:$4 sm:$0xff]   ;;  %v2388_v49 = vld [vmem:[%s2735_s20 + $0x3b0] ss:$8 sps:$4 sm:$0xff]  }
  0x21   : > { %1755 = vmatprep.subr.bf16.mxu0 %v2343_v17  ;;  %v224_v46 = vld [vmem:[%s2785_s25] sm:$0xff]  ;;  %v227_v50 = vld [vmem:[%s2785_s25 + $0x18] sm:$0xff] }
  0x22   : > { %v2028_v48 = vcombine.high %v224_v46, %v224_v46  ;;  %v2389_v51 = vld [vmem:[%s2735_s20 + $0xc4] ss:$8 sps:$4 sm:$0xff]   ;;  %v2034_v53 = vcombine.high %v227_v50, %v227_v50  ;;  %v2393_v54 = vld [vmem:[%s2735_s20 + $0xc0] ss:$8 sps:$4 sm:$0xff]   ;;  %v2395_v56 = vld [vmem:[%s2735_s20 + $0xd4] ss:$8 sps:$4 sm:$0xff]   ;;  %v2027_v6 = vcombine.low %v224_v46, %v224_v46  ;;  %v2033_v7 = vcombine.low %v227_v50, %v227_v50 }
  0x23   : > { %1633 = vmatpush1.bf16.msra.mxu1 %v2345_v18  ;;  %v2391_v52 = vld [vmem:[%s2735_s20 + $0x3c4] ss:$8 sps:$4 sm:$0xff]   ;;  %v2394_v55 = vld [vmem:[%s2735_s20 + $0x3c0] ss:$8 sps:$4 sm:$0xff]   ;;  %v2397_v57 = vld [vmem:[%s2735_s20 + $0x3d4] ss:$8 sps:$4 sm:$0xff]  }
  0x24   : > { %1756 = vmatpush1.bf16.msra.mxu0 %v2346_v19  ;;  %1634 = vmatprep.subr.bf16.mxu1 %v2347_v20  ;;  %v2399_v58 = vld [vmem:[%s2735_s20 + $0xd0] ss:$8 sps:$4 sm:$0xff]   ;;  %v2401_v60 = vld [vmem:[%s2735_s20 + $0xe4] ss:$8 sps:$4 sm:$0xff]   ;;  %v2405_v62 = vld [vmem:[%s2735_s20 + $0xe0] ss:$8 sps:$4 sm:$0xff]  }
  0x25   : > { %1757 = vmatprep.subr.bf16.mxu0 %v2349_v21  ;;  %1656 = vmatprep.mubr.bf16.mxu1 %v2028_v48  ;;  %v2400_v59 = vld [vmem:[%s2735_s20 + $0x3d0] ss:$8 sps:$4 sm:$0xff]   ;;  %v2403_v61 = vld [vmem:[%s2735_s20 + $0x3e4] ss:$8 sps:$4 sm:$0xff]   ;;  %v2406_v63 = vld [vmem:[%s2735_s20 + $0x3e0] ss:$8 sps:$4 sm:$0xff]  }
  0x26   : > { %1779 = vmatprep.mubr.bf16.mxu0 %v2034_v53  ;;  %v2407_v0 = vld [vmem:[%s2735_s20 + $0xf4] ss:$8 sps:$4 sm:$0xff]   ;;  %v2411_v2 = vld [vmem:[%s2735_s20 + $0xf0] ss:$8 sps:$4 sm:$0xff]   ;;  %v2417_v4 = vld [vmem:[%s2735_s20 + $0x104] ss:$8 sps:$4 sm:$0xff]  }
  0x27   : > { %1635 = vmatpush1.bf16.msra.mxu1 %v2351_v22  ;;  %v2409_v1 = vld [vmem:[%s2735_s20 + $0x3f4] ss:$8 sps:$4 sm:$0xff]   ;;  %v2412_v3 = vld [vmem:[%s2735_s20 + $0x3f0] ss:$8 sps:$4 sm:$0xff]   ;;  %v2422_v5 = vld [vmem:[%s2735_s20 + $0x404] ss:$8 sps:$4 sm:$0xff]  }
  0x28   : > { %1758 = vmatpush1.bf16.msra.mxu0 %v2352_v23  ;;  %1636 = vmatprep.subr.bf16.mxu1 %v2353_v24  ;;  %v2415_v8 = vld [vmem:[%s2735_s20 + $0x100] ss:$8 sps:$4 sm:$0xff]   ;;  %v2425_v10 = vld [vmem:[%s2735_s20 + $0x114] ss:$8 sps:$4 sm:$0xff]   ;;  %v2423_v12 = vld [vmem:[%s2735_s20 + $0x110] ss:$8 sps:$4 sm:$0xff]  }
  0x29   : > { %1759 = vmatprep.subr.bf16.mxu0 %v2355_v25  ;;  %v2420_v9 = vld [vmem:[%s2735_s20 + $0x400] ss:$8 sps:$4 sm:$0xff]   ;;  %v2428_v11 = vld [vmem:[%s2735_s20 + $0x414] ss:$8 sps:$4 sm:$0xff]   ;;  %v2426_v13 = vld [vmem:[%s2735_s20 + $0x410] ss:$8 sps:$4 sm:$0xff]  }
  0x2a   : > { %v2431_v14 = vld [vmem:[%s2735_s20 + $0x124] ss:$8 sps:$4 sm:$0xff]   ;;  %v2429_v16 = vld [vmem:[%s2735_s20 + $0x120] ss:$8 sps:$4 sm:$0xff]   ;;  %v2437_v18 = vld [vmem:[%s2735_s20 + $0x134] ss:$8 sps:$4 sm:$0xff]  }
  0x2b   : > { %1637 = vmatpush1.bf16.msra.mxu1 %v2357_v26  ;;  %v2434_v15 = vld [vmem:[%s2735_s20 + $0x424] ss:$8 sps:$4 sm:$0xff]   ;;  %v2432_v17 = vld [vmem:[%s2735_s20 + $0x420] ss:$8 sps:$4 sm:$0xff]   ;;  %v2440_v19 = vld [vmem:[%s2735_s20 + $0x434] ss:$8 sps:$4 sm:$0xff]  }
  0x2c   : > { %1760 = vmatpush1.bf16.msra.mxu0 %v2358_v27  ;;  %1638 = vmatprep.subr.bf16.mxu1 %v2359_v28  ;;  %v2435_v20 = vld [vmem:[%s2735_s20 + $0x130] ss:$8 sps:$4 sm:$0xff]   ;;  %v2443_v22 = vld [vmem:[%s2735_s20 + $0x144] ss:$8 sps:$4 sm:$0xff]   ;;  %v2441_v24 = vld [vmem:[%s2735_s20 + $0x140] ss:$8 sps:$4 sm:$0xff]  }
  0x2d   : > { %1761 = vmatprep.subr.bf16.mxu0 %v2361_v29  ;;  %v2438_v21 = vld [vmem:[%s2735_s20 + $0x430] ss:$8 sps:$4 sm:$0xff]   ;;  %v2446_v23 = vld [vmem:[%s2735_s20 + $0x444] ss:$8 sps:$4 sm:$0xff]   ;;  %v2444_v25 = vld [vmem:[%s2735_s20 + $0x440] ss:$8 sps:$4 sm:$0xff]  }
  0x2e   : > { %v2449_v26 = vld [vmem:[%s2735_s20 + $0x154] ss:$8 sps:$4 sm:$0xff]   ;;  %v2447_v28 = vld [vmem:[%s2735_s20 + $0x150] ss:$8 sps:$4 sm:$0xff]   ;;  %v2479_v50 = vld [vmem:[%s2735_s20 + $0x1a4] ss:$8 sps:$4 sm:$0xff]  }
  0x2f   : > { %1639 = vmatpush1.bf16.msra.mxu1 %v2363_v30  ;;  %v2452_v27 = vld [vmem:[%s2735_s20 + $0x454] ss:$8 sps:$4 sm:$0xff]   ;;  %v2450_v29 = vld [vmem:[%s2735_s20 + $0x450] ss:$8 sps:$4 sm:$0xff]   ;;  %v2455_v30 = vld [vmem:[%s2735_s20 + $0x164] ss:$8 sps:$4 sm:$0xff]  }
  0x30   : > { %1762 = vmatpush1.bf16.msra.mxu0 %v2364_v31  ;;  %1640 = vmatprep.subr.bf16.mxu1 %v2365_v32  ;;  %v2458_v31 = vld [vmem:[%s2735_s20 + $0x464] ss:$8 sps:$4 sm:$0xff]   ;;  %v2473_v46 = vld [vmem:[%s2735_s20 + $0x194] ss:$8 sps:$4 sm:$0xff]   ;;  %v2471_v48 = vld [vmem:[%s2735_s20 + $0x190] ss:$8 sps:$4 sm:$0xff]  }
  0x31   : > { %1763 = vmatprep.subr.bf16.mxu0 %v2367_v33  ;;  %v2836_v32 = vld [vmem:[%s2785_s25 + $0x8] sm:$0xff] }
  0x32   : > { %v2453_v33 = vld [vmem:[%s2735_s20 + $0x160] ss:$8 sps:$4 sm:$0xff]  }
  0x33   : > { %1641 = vmatpush1.bf16.msra.mxu1 %v2369_v34  ;;  %v2456_v34 = vld [vmem:[%s2735_s20 + $0x460] ss:$8 sps:$4 sm:$0xff]  }
  0x34   : > { %1764 = vmatpush1.bf16.msra.mxu0 %v2370_v35  ;;  %1642 = vmatprep.subr.bf16.mxu1 %v2371_v36  ;;  %v2030_v35 = vcombine.high %v2836_v32, %v2836_v32  ;;  %v2843_v36 = vld [vmem:[%s2785_s25 + $0x20] sm:$0xff] }
  0x35   : > { %1765 = vmatprep.subr.bf16.mxu0 %v2373_v37  ;;  %v2461_v37 = vld [vmem:[%s2735_s20 + $0x174] ss:$8 sps:$4 sm:$0xff]   ;;  %v2480_v53 = vld [vmem:[%s2735_s20 + $0x4a0] ss:$8 sps:$4 sm:$0xff]  }
  0x37   : > { %1643 = vmatpush1.bf16.msra.mxu1 %v2375_v38  ;;  %v2036_v38 = vcombine.high %v2843_v36, %v2843_v36 }
  0x38   : > { %1766 = vmatpush1.bf16.msra.mxu0 %v2376_v39  ;;  %1644 = vmatprep.subr.bf16.mxu1 %v2377_v40  ;;  %v2464_v39 = vld [vmem:[%s2735_s20 + $0x474] ss:$8 sps:$4 sm:$0xff]   ;;  %v2459_v40 = vld [vmem:[%s2735_s20 + $0x170] ss:$8 sps:$4 sm:$0xff]  }
  0x39   : > { %1767 = vmatprep.subr.bf16.mxu0 %v2379_v41  ;;  %v2462_v41 = vld [vmem:[%s2735_s20 + $0x470] ss:$8 sps:$4 sm:$0xff]  }
  0x3b   : > { %1645 = vmatpush1.bf16.msra.mxu1 %v2381_v42  ;;  %v2467_v42 = vld [vmem:[%s2735_s20 + $0x184] ss:$8 sps:$4 sm:$0xff]  }
  0x3c   : > { %1768 = vmatpush1.bf16.msra.mxu0 %v2382_v43  ;;  %1646 = vmatprep.subr.bf16.mxu1 %v2383_v44  ;;  %v2470_v43 = vld [vmem:[%s2735_s20 + $0x484] ss:$8 sps:$4 sm:$0xff]   ;;  %v2465_v44 = vld [vmem:[%s2735_s20 + $0x180] ss:$8 sps:$4 sm:$0xff]  }
  0x3d   : > { %1769 = vmatprep.subr.bf16.mxu0 %v2385_v45  ;;  %v2468_v45 = vld [vmem:[%s2735_s20 + $0x480] ss:$8 sps:$4 sm:$0xff]  }
  0x3f   : > { %1647 = vmatpush1.bf16.msra.mxu1 %v2387_v47  ;;  %v2476_v47 = vld [vmem:[%s2735_s20 + $0x494] ss:$8 sps:$4 sm:$0xff]  }
  0x40   : > { %1770 = vmatpush1.bf16.msra.mxu0 %v2388_v49  ;;  %1648 = vmatprep.subr.bf16.mxu1 %v2389_v51  ;;  %v2474_v49 = vld [vmem:[%s2735_s20 + $0x490] ss:$8 sps:$4 sm:$0xff]   ;;  %v2482_v51 = vld [vmem:[%s2735_s20 + $0x4a4] ss:$8 sps:$4 sm:$0xff]  }
  0x41   : > { %1771 = vmatprep.subr.bf16.mxu0 %v2391_v52  ;;  %v2477_v52 = vld [vmem:[%s2735_s20 + $0x1a0] ss:$8 sps:$4 sm:$0xff]  }
  0x43   : > { %1649 = vmatpush1.bf16.msra.mxu1 %v2393_v54  ;;  %v2485_v54 = vld [vmem:[%s2735_s20 + $0x1b4] ss:$8 sps:$4 sm:$0xff]  }
  0x44   : > { %1772 = vmatpush1.bf16.msra.mxu0 %v2394_v55  ;;  %1650 = vmatprep.subr.bf16.mxu1 %v2395_v56  ;;  %v2488_v55 = vld [vmem:[%s2735_s20 + $0x4b4] ss:$8 sps:$4 sm:$0xff]   ;;  %v2483_v56 = vld [vmem:[%s2735_s20 + $0x1b0] ss:$8 sps:$4 sm:$0xff]  }
  0x45   : > { %1773 = vmatprep.subr.bf16.mxu0 %v2397_v57  ;;  %v2486_v57 = vld [vmem:[%s2735_s20 + $0x4b0] ss:$8 sps:$4 sm:$0xff]  }
  0x47   : > { %1651 = vmatpush1.bf16.msra.mxu1 %v2399_v58  ;;  %v2491_v58 = vld [vmem:[%s2735_s20 + $0x1c4] ss:$8 sps:$4 sm:$0xff]  }
  0x48   : > { %1774 = vmatpush1.bf16.msra.mxu0 %v2400_v59  ;;  %1652 = vmatprep.subr.bf16.mxu1 %v2401_v60  ;;  %v2494_v59 = vld [vmem:[%s2735_s20 + $0x4c4] ss:$8 sps:$4 sm:$0xff]   ;;  %v2489_v60 = vld [vmem:[%s2735_s20 + $0x1c0] ss:$8 sps:$4 sm:$0xff]  }
  0x49   : > { %1775 = vmatprep.subr.bf16.mxu0 %v2403_v61  ;;  %v2492_v61 = vld [vmem:[%s2735_s20 + $0x4c0] ss:$8 sps:$4 sm:$0xff]  }
  0x4b   : > { %1653 = vmatpush1.bf16.msra.mxu1 %v2405_v62  ;;  %v2497_v62 = vld [vmem:[%s2735_s20 + $0x1d4] ss:$8 sps:$4 sm:$0xff]  }
  0x4c   : > { %1776 = vmatpush1.bf16.msra.mxu0 %v2406_v63  ;;  %1654 = vmatprep.subr.bf16.mxu1 %v2407_v0  ;;  %v2500_v63 = vld [vmem:[%s2735_s20 + $0x4d4] ss:$8 sps:$4 sm:$0xff]   ;;  %v2495_v0 = vld [vmem:[%s2735_s20 + $0x1d0] ss:$8 sps:$4 sm:$0xff]  }
  0x4d   : > { %1777 = vmatprep.subr.bf16.mxu0 %v2409_v1  ;;  %v2498_v1 = vld [vmem:[%s2735_s20 + $0x4d0] ss:$8 sps:$4 sm:$0xff]  }
  0x4f   : > { %1655 = vmatpush1.bf16.msra.mxu1 %v2411_v2  ;;  %v2503_v2 = vld [vmem:[%s2735_s20 + $0x1e4] ss:$8 sps:$4 sm:$0xff]  }
  0x50   : > { %1778 = vmatpush1.bf16.msra.mxu0 %v2412_v3  ;;  %1665 = vmatprep.subr.bf16.mxu1 %v2417_v4  ;;  %v2506_v3 = vld [vmem:[%s2735_s20 + $0x4e4] ss:$8 sps:$4 sm:$0xff]   ;;  %v2501_v4 = vld [vmem:[%s2735_s20 + $0x1e0] ss:$8 sps:$4 sm:$0xff]  }
  0x51   : > { %1788 = vmatprep.subr.bf16.mxu0 %v2422_v5  ;;  %v2504_v5 = vld [vmem:[%s2735_s20 + $0x4e0] ss:$8 sps:$4 sm:$0xff]  }
  0x52   : > { %1657 = vmatmul.mubr.bf16.vlgmr.msra.gmra.mrb[0].mxu1 %v2027_v6  ;;  %v2509_v6 = vld [vmem:[%s2735_s20 + $0x1f4] ss:$8 sps:$4 sm:$0xff]  }
  0x53   : > { %1780 = vmatmul.mubr.bf16.vlgmr.msra.gmra.mrb[0].mxu0 %v2033_v7  ;;  %1666 = vmatpush1.bf16.msra.mxu1 %v2415_v8  ;;  %v2512_v7 = vld [vmem:[%s2735_s20 + $0x4f4] ss:$8 sps:$4 sm:$0xff]   ;;  %v2507_v8 = vld [vmem:[%s2735_s20 + $0x1f0] ss:$8 sps:$4 sm:$0xff]  }
  0x54   : > { %1789 = vmatpush1.bf16.msra.mxu0 %v2420_v9  ;;  %1667 = vmatprep.subr.bf16.mxu1 %v2425_v10  ;;  %v2510_v9 = vld [vmem:[%s2735_s20 + $0x4f0] ss:$8 sps:$4 sm:$0xff]   ;;  %v2517_v10 = vld [vmem:[%s2735_s20 + $0x204] ss:$8 sps:$4 sm:$0xff]  }
  0x55   : > { %1790 = vmatprep.subr.bf16.mxu0 %v2428_v11  ;;  %1697 = vmatprep.mubr.bf16.mxu1 %v2030_v35  ;;  %v2522_v11 = vld [vmem:[%s2735_s20 + $0x504] ss:$8 sps:$4 sm:$0xff]   ;;  %v2544_v35 = vld [vmem:[%s2735_s20 + $0x540] ss:$8 sps:$4 sm:$0xff]  }
  0x56   : > { %1820 = vmatprep.mubr.bf16.mxu0 %v2036_v38  ;;  %v2547_v38 = vld [vmem:[%s2735_s20 + $0x250] ss:$8 sps:$4 sm:$0xff]  }
  0x57   : > { %1668 = vmatpush1.bf16.msra.mxu1 %v2423_v12  ;;  %v2029_v12 = vcombine.low %v2836_v32, %v2836_v32  ;;  %v2543_v32 = vld [vmem:[%s2735_s20 + $0x244] ss:$8 sps:$4 sm:$0xff]  }
  0x58   : > { %1791 = vmatpush1.bf16.msra.mxu0 %v2426_v13  ;;  %1669 = vmatprep.subr.bf16.mxu1 %v2431_v14  ;;  %v2515_v13 = vld [vmem:[%s2735_s20 + $0x200] ss:$8 sps:$4 sm:$0xff]   ;;  %v2035_v14 = vcombine.low %v2843_v36, %v2843_v36  ;;  %v2549_v36 = vld [vmem:[%s2735_s20 + $0x254] ss:$8 sps:$4 sm:$0xff]  }
  0x59   : > { %1792 = vmatprep.subr.bf16.mxu0 %v2434_v15  ;;  %v2520_v15 = vld [vmem:[%s2735_s20 + $0x500] ss:$8 sps:$4 sm:$0xff]  }
  0x5b   : > { %1670 = vmatpush1.bf16.msra.mxu1 %v2429_v16  ;;  %v2525_v16 = vld [vmem:[%s2735_s20 + $0x214] ss:$8 sps:$4 sm:$0xff]  }
  0x5c   : > { %1793 = vmatpush1.bf16.msra.mxu0 %v2432_v17  ;;  %1671 = vmatprep.subr.bf16.mxu1 %v2437_v18  ;;  %v2528_v17 = vld [vmem:[%s2735_s20 + $0x514] ss:$8 sps:$4 sm:$0xff]  }
  0x5d   : > { %1794 = vmatprep.subr.bf16.mxu0 %v2440_v19  ;;  %v2894_v18 = vld [vmem:[%s2785_s25 + $0x10] sm:$0xff]  ;;  %v2897_v19 = vld [vmem:[%s2785_s25 + $0x28] sm:$0xff] }
  0x5f   : > { %1672 = vmatpush1.bf16.msra.mxu1 %v2435_v20  ;;  %v2032_v20 = vcombine.high %v2894_v18, %v2894_v18 }
  0x60   : > { %1795 = vmatpush1.bf16.msra.mxu0 %v2438_v21  ;;  %1673 = vmatprep.subr.bf16.mxu1 %v2443_v22  ;;  %v2038_v21 = vcombine.high %v2897_v19, %v2897_v19  ;;  %v2523_v22 = vld [vmem:[%s2735_s20 + $0x210] ss:$8 sps:$4 sm:$0xff]  }
  0x61   : > { %1796 = vmatprep.subr.bf16.mxu0 %v2446_v23  ;;  %v2526_v23 = vld [vmem:[%s2735_s20 + $0x510] ss:$8 sps:$4 sm:$0xff]  }
  0x63   : > { %1674 = vmatpush1.bf16.msra.mxu1 %v2441_v24  ;;  %v2531_v24 = vld [vmem:[%s2735_s20 + $0x224] ss:$8 sps:$4 sm:$0xff]  }
  0x64   : > { %1797 = vmatpush1.bf16.msra.mxu0 %v2444_v25  ;;  %1675 = vmatprep.subr.bf16.mxu1 %v2449_v26  ;;  %v2534_v25 = vld [vmem:[%s2735_s20 + $0x524] ss:$8 sps:$4 sm:$0xff]   ;;  %v2529_v26 = vld [vmem:[%s2735_s20 + $0x220] ss:$8 sps:$4 sm:$0xff]  }
  0x65   : > { %1798 = vmatprep.subr.bf16.mxu0 %v2452_v27  ;;  %v2532_v27 = vld [vmem:[%s2735_s20 + $0x520] ss:$8 sps:$4 sm:$0xff]  }
  0x67   : > { %1676 = vmatpush1.bf16.msra.mxu1 %v2447_v28  ;;  %v2537_v28 = vld [vmem:[%s2735_s20 + $0x234] ss:$8 sps:$4 sm:$0xff]  }
  0x68   : > { %1799 = vmatpush1.bf16.msra.mxu0 %v2450_v29  ;;  %1677 = vmatprep.subr.bf16.mxu1 %v2455_v30  ;;  %v2540_v29 = vld [vmem:[%s2735_s20 + $0x534] ss:$8 sps:$4 sm:$0xff]   ;;  %v2535_v30 = vld [vmem:[%s2735_s20 + $0x230] ss:$8 sps:$4 sm:$0xff]  }
  0x69   : > { %1800 = vmatprep.subr.bf16.mxu0 %v2458_v31  ;;  %v2538_v31 = vld [vmem:[%s2735_s20 + $0x530] ss:$8 sps:$4 sm:$0xff]  }
  0x6b   : > { %1678 = vmatpush1.bf16.msra.mxu1 %v2453_v33  ;;  %v2546_v33 = vld [vmem:[%s2735_s20 + $0x544] ss:$8 sps:$4 sm:$0xff]  }
  0x6c   : > { %1801 = vmatpush1.bf16.msra.mxu0 %v2456_v34  ;;  %1679 = vmatprep.subr.bf16.mxu1 %v2461_v37  ;;  %v2541_v34 = vld [vmem:[%s2735_s20 + $0x240] ss:$8 sps:$4 sm:$0xff]   ;;  %v2552_v37 = vld [vmem:[%s2735_s20 + $0x554] ss:$8 sps:$4 sm:$0xff]  }
  0x6d   : > { %1802 = vmatprep.subr.bf16.mxu0 %v2464_v39  ;;  %v2550_v39 = vld [vmem:[%s2735_s20 + $0x550] ss:$8 sps:$4 sm:$0xff]  }
  0x6f   : > { %1680 = vmatpush1.bf16.msra.mxu1 %v2459_v40  ;;  %v2555_v40 = vld [vmem:[%s2735_s20 + $0x264] ss:$8 sps:$4 sm:$0xff]  }
  0x70   : > { %1803 = vmatpush1.bf16.msra.mxu0 %v2462_v41  ;;  %1681 = vmatprep.subr.bf16.mxu1 %v2467_v42  ;;  %v2558_v41 = vld [vmem:[%s2735_s20 + $0x564] ss:$8 sps:$4 sm:$0xff]   ;;  %v2553_v42 = vld [vmem:[%s2735_s20 + $0x260] ss:$8 sps:$4 sm:$0xff]  }
  0x71   : > { %1804 = vmatprep.subr.bf16.mxu0 %v2470_v43  ;;  %v2556_v43 = vld [vmem:[%s2735_s20 + $0x560] ss:$8 sps:$4 sm:$0xff]  }
  0x73   : > { %1682 = vmatpush1.bf16.msra.mxu1 %v2465_v44  ;;  %v2561_v44 = vld [vmem:[%s2735_s20 + $0x274] ss:$8 sps:$4 sm:$0xff]  }
  0x74   : > { %1805 = vmatpush1.bf16.msra.mxu0 %v2468_v45  ;;  %1683 = vmatprep.subr.bf16.mxu1 %v2473_v46  ;;  %v2564_v45 = vld [vmem:[%s2735_s20 + $0x574] ss:$8 sps:$4 sm:$0xff]   ;;  %v2559_v46 = vld [vmem:[%s2735_s20 + $0x270] ss:$8 sps:$4 sm:$0xff]  }
  0x75   : > { %1806 = vmatprep.subr.bf16.mxu0 %v2476_v47  ;;  %v2562_v47 = vld [vmem:[%s2735_s20 + $0x570] ss:$8 sps:$4 sm:$0xff]  }
  0x77   : > { %1684 = vmatpush1.bf16.msra.mxu1 %v2471_v48  ;;  %v2567_v48 = vld [vmem:[%s2735_s20 + $0x284] ss:$8 sps:$4 sm:$0xff]  }
  0x78   : > { %1807 = vmatpush1.bf16.msra.mxu0 %v2474_v49  ;;  %1685 = vmatprep.subr.bf16.mxu1 %v2479_v50  ;;  %v2570_v49 = vld [vmem:[%s2735_s20 + $0x584] ss:$8 sps:$4 sm:$0xff]   ;;  %v2565_v50 = vld [vmem:[%s2735_s20 + $0x280] ss:$8 sps:$4 sm:$0xff]  }
  0x79   : > { %1808 = vmatprep.subr.bf16.mxu0 %v2482_v51  ;;  %v2568_v51 = vld [vmem:[%s2735_s20 + $0x580] ss:$8 sps:$4 sm:$0xff]  }
  0x7b   : > { %1686 = vmatpush1.bf16.msra.mxu1 %v2477_v52  ;;  %v2573_v52 = vld [vmem:[%s2735_s20 + $0x294] ss:$8 sps:$4 sm:$0xff]  }
  0x7c   : > { %1809 = vmatpush1.bf16.msra.mxu0 %v2480_v53  ;;  %1687 = vmatprep.subr.bf16.mxu1 %v2485_v54  ;;  %v2576_v53 = vld [vmem:[%s2735_s20 + $0x594] ss:$8 sps:$4 sm:$0xff]   ;;  %v2571_v54 = vld [vmem:[%s2735_s20 + $0x290] ss:$8 sps:$4 sm:$0xff]  }
  0x7d   : > { %1810 = vmatprep.subr.bf16.mxu0 %v2488_v55  ;;  %v2574_v55 = vld [vmem:[%s2735_s20 + $0x590] ss:$8 sps:$4 sm:$0xff]  }
  0x7f   : > { %1688 = vmatpush1.bf16.msra.mxu1 %v2483_v56  ;;  %v2579_v56 = vld [vmem:[%s2735_s20 + $0x2a4] ss:$8 sps:$4 sm:$0xff]  }
  0x80   : > { %1811 = vmatpush1.bf16.msra.mxu0 %v2486_v57  ;;  %1689 = vmatprep.subr.bf16.mxu1 %v2491_v58  ;;  %v2582_v57 = vld [vmem:[%s2735_s20 + $0x5a4] ss:$8 sps:$4 sm:$0xff]   ;;  %v2577_v58 = vld [vmem:[%s2735_s20 + $0x2a0] ss:$8 sps:$4 sm:$0xff]  }
  0x81   : > { %1812 = vmatprep.subr.bf16.mxu0 %v2494_v59  ;;  %v2580_v59 = vld [vmem:[%s2735_s20 + $0x5a0] ss:$8 sps:$4 sm:$0xff]  }
  0x83   : > { %1690 = vmatpush1.bf16.msra.mxu1 %v2489_v60  ;;  %v2585_v60 = vld [vmem:[%s2735_s20 + $0x2b4] ss:$8 sps:$4 sm:$0xff]  }
  0x84   : > { %1813 = vmatpush1.bf16.msra.mxu0 %v2492_v61  ;;  %1691 = vmatprep.subr.bf16.mxu1 %v2497_v62  ;;  %v2588_v61 = vld [vmem:[%s2735_s20 + $0x5b4] ss:$8 sps:$4 sm:$0xff]   ;;  %v2583_v62 = vld [vmem:[%s2735_s20 + $0x2b0] ss:$8 sps:$4 sm:$0xff]  }
  0x85   : > { %1814 = vmatprep.subr.bf16.mxu0 %v2500_v63  ;;  %v2586_v63 = vld [vmem:[%s2735_s20 + $0x5b0] ss:$8 sps:$4 sm:$0xff]  }
  0x87   : > { %1692 = vmatpush1.bf16.msra.mxu1 %v2495_v0  ;;  %v2591_v0 = vld [vmem:[%s2735_s20 + $0x2c4] ss:$8 sps:$4 sm:$0xff]  }
  0x88   : > { %1815 = vmatpush1.bf16.msra.mxu0 %v2498_v1  ;;  %1693 = vmatprep.subr.bf16.mxu1 %v2503_v2  ;;  %v2594_v1 = vld [vmem:[%s2735_s20 + $0x5c4] ss:$8 sps:$4 sm:$0xff]   ;;  %v2589_v2 = vld [vmem:[%s2735_s20 + $0x2c0] ss:$8 sps:$4 sm:$0xff]  }
  0x89   : > { %1816 = vmatprep.subr.bf16.mxu0 %v2506_v3  ;;  %v2592_v3 = vld [vmem:[%s2735_s20 + $0x5c0] ss:$8 sps:$4 sm:$0xff]  }
  0x8b   : > { %1694 = vmatpush1.bf16.msra.mxu1 %v2501_v4  ;;  %v2597_v4 = vld [vmem:[%s2735_s20 + $0x2d4] ss:$8 sps:$4 sm:$0xff]  }
  0x8c   : > { %1817 = vmatpush1.bf16.msra.mxu0 %v2504_v5  ;;  %1695 = vmatprep.subr.bf16.mxu1 %v2509_v6  ;;  %v2600_v5 = vld [vmem:[%s2735_s20 + $0x5d4] ss:$8 sps:$4 sm:$0xff]   ;;  %v2595_v6 = vld [vmem:[%s2735_s20 + $0x2d0] ss:$8 sps:$4 sm:$0xff]  }
  0x8d   : > { %1818 = vmatprep.subr.bf16.mxu0 %v2512_v7  ;;  %v2598_v7 = vld [vmem:[%s2735_s20 + $0x5d0] ss:$8 sps:$4 sm:$0xff]  }
  0x8f   : > { %1696 = vmatpush1.bf16.msra.mxu1 %v2507_v8  ;;  %v2603_v8 = vld [vmem:[%s2735_s20 + $0x2e4] ss:$8 sps:$4 sm:$0xff]  }
  0x90   : > { %1819 = vmatpush1.bf16.msra.mxu0 %v2510_v9  ;;  %1706 = vmatprep.subr.bf16.mxu1 %v2517_v10  ;;  %v2606_v9 = vld [vmem:[%s2735_s20 + $0x5e4] ss:$8 sps:$4 sm:$0xff]   ;;  %v2601_v10 = vld [vmem:[%s2735_s20 + $0x2e0] ss:$8 sps:$4 sm:$0xff]  }
  0x91   : > { %1829 = vmatprep.subr.bf16.mxu0 %v2522_v11  ;;  %v2604_v11 = vld [vmem:[%s2735_s20 + $0x5e0] ss:$8 sps:$4 sm:$0xff]  }
  0x92   : > { %1698 = vmatmul.mubr.bf16.vlgmr.msra.gmra.mrb[0].mxu1 %v2029_v12  ;;  %v2609_v12 = vld [vmem:[%s2735_s20 + $0x2f4] ss:$8 sps:$4 sm:$0xff]  }
  0x93   : > { %1821 = vmatmul.mubr.bf16.vlgmr.msra.gmra.mrb[0].mxu0 %v2035_v14  ;;  %1707 = vmatpush1.bf16.msra.mxu1 %v2515_v13  ;;  %v2612_v13 = vld [vmem:[%s2735_s20 + $0x5f4] ss:$8 sps:$4 sm:$0xff]   ;;  %v2607_v14 = vld [vmem:[%s2735_s20 + $0x2f0] ss:$8 sps:$4 sm:$0xff]  }
  0x94   : > { %1830 = vmatpush1.bf16.msra.mxu0 %v2520_v15  ;;  %1708 = vmatprep.subr.bf16.mxu1 %v2525_v16  ;;  %v2610_v15 = vld [vmem:[%s2735_s20 + $0x5f0] ss:$8 sps:$4 sm:$0xff]   ;;  %v2619_v16 = vld [vmem:[%s2735_s20 + $0x604] ss:$8 sps:$4 sm:$0xff]  }
  0x95   : > { %1831 = vmatprep.subr.bf16.mxu0 %v2528_v17  ;;  %1738 = vmatprep.mubr.bf16.mxu1 %v2032_v20  ;;  %v2963_v17 = vld [vmem:[%s2785_s25 + $0x30] sm:$0xff]  ;;  %v2031_v20 = vcombine.low %v2894_v18, %v2894_v18 }
  0x96   : > { %1861 = vmatprep.mubr.bf16.mxu0 %v2038_v21  ;;  %v2037_v21 = vcombine.low %v2897_v19, %v2897_v19  ;;  %v2620_v18 = vld [vmem:[%s2735_s20 + $0x610] ss:$8 sps:$4 sm:$0xff]   ;;  %v2625_v19 = vld [vmem:[%s2735_s20 + $0x624] ss:$8 sps:$4 sm:$0xff]  }
  0x97   : > { %1709 = vmatpush1.bf16.msra.mxu1 %v2523_v22  ;;  %v2617_v22 = vld [vmem:[%s2735_s20 + $0x600] ss:$8 sps:$4 sm:$0xff]  }
  0x98   : > { %1832 = vmatpush1.bf16.msra.mxu0 %v2526_v23  ;;  %1710 = vmatprep.subr.bf16.mxu1 %v2531_v24  ;;  %v2040_v23 = vcombine.high %v2963_v17, %v2963_v17  ;;  %v2622_v24 = vld [vmem:[%s2735_s20 + $0x614] ss:$8 sps:$4 sm:$0xff]  }
  0x99   : > { %1833 = vmatprep.subr.bf16.mxu0 %v2534_v25  ;;  %v2623_v25 = vld [vmem:[%s2735_s20 + $0x620] ss:$8 sps:$4 sm:$0xff]  }
  0x9b   : > { %1711 = vmatpush1.bf16.msra.mxu1 %v2529_v26  ;;  %v2628_v26 = vld [vmem:[%s2735_s20 + $0x634] ss:$8 sps:$4 sm:$0xff]  }
  0x9c   : > { %1834 = vmatpush1.bf16.msra.mxu0 %v2532_v27  ;;  %1712 = vmatprep.subr.bf16.mxu1 %v2537_v28  ;;  %v2626_v27 = vld [vmem:[%s2735_s20 + $0x630] ss:$8 sps:$4 sm:$0xff]   ;;  %v2631_v28 = vld [vmem:[%s2735_s20 + $0x644] ss:$8 sps:$4 sm:$0xff]  }
  0x9d   : > { %1835 = vmatprep.subr.bf16.mxu0 %v2540_v29  ;;  %v2629_v29 = vld [vmem:[%s2735_s20 + $0x640] ss:$8 sps:$4 sm:$0xff]  }
  0x9f   : > { %1713 = vmatpush1.bf16.msra.mxu1 %v2535_v30  ;;  %v2634_v30 = vld [vmem:[%s2735_s20 + $0x654] ss:$8 sps:$4 sm:$0xff]  }
  0xa0   : > { %1836 = vmatpush1.bf16.msra.mxu0 %v2538_v31  ;;  %1714 = vmatprep.subr.bf16.mxu1 %v2543_v32  ;;  %v2632_v31 = vld [vmem:[%s2735_s20 + $0x650] ss:$8 sps:$4 sm:$0xff]   ;;  %v2637_v32 = vld [vmem:[%s2735_s20 + $0x664] ss:$8 sps:$4 sm:$0xff]  }
  0xa1   : > { %1837 = vmatprep.subr.bf16.mxu0 %v2546_v33  ;;  %v2635_v33 = vld [vmem:[%s2735_s20 + $0x660] ss:$8 sps:$4 sm:$0xff]  }
  0xa3   : > { %1715 = vmatpush1.bf16.msra.mxu1 %v2541_v34  ;;  %v2640_v34 = vld [vmem:[%s2735_s20 + $0x674] ss:$8 sps:$4 sm:$0xff]  }
  0xa4   : > { %1838 = vmatpush1.bf16.msra.mxu0 %v2544_v35  ;;  %1716 = vmatprep.subr.bf16.mxu1 %v2549_v36  ;;  %v2638_v35 = vld [vmem:[%s2735_s20 + $0x670] ss:$8 sps:$4 sm:$0xff]   ;;  %v2643_v36 = vld [vmem:[%s2735_s20 + $0x684] ss:$8 sps:$4 sm:$0xff]  }
  0xa5   : > { %1839 = vmatprep.subr.bf16.mxu0 %v2552_v37  ;;  %v2641_v37 = vld [vmem:[%s2735_s20 + $0x680] ss:$8 sps:$4 sm:$0xff]  }
  0xa7   : > { %1717 = vmatpush1.bf16.msra.mxu1 %v2547_v38  ;;  %v2646_v38 = vld [vmem:[%s2735_s20 + $0x694] ss:$8 sps:$4 sm:$0xff]  }
  0xa8   : > { %1840 = vmatpush1.bf16.msra.mxu0 %v2550_v39  ;;  %1718 = vmatprep.subr.bf16.mxu1 %v2555_v40  ;;  %v2644_v39 = vld [vmem:[%s2735_s20 + $0x690] ss:$8 sps:$4 sm:$0xff]   ;;  %v2649_v40 = vld [vmem:[%s2735_s20 + $0x6a4] ss:$8 sps:$4 sm:$0xff]  }
  0xa9   : > { %1841 = vmatprep.subr.bf16.mxu0 %v2558_v41  ;;  %v2647_v41 = vld [vmem:[%s2735_s20 + $0x6a0] ss:$8 sps:$4 sm:$0xff]  }
  0xab   : > { %1719 = vmatpush1.bf16.msra.mxu1 %v2553_v42  ;;  %v2652_v42 = vld [vmem:[%s2735_s20 + $0x6b4] ss:$8 sps:$4 sm:$0xff]  }
  0xac   : > { %1842 = vmatpush1.bf16.msra.mxu0 %v2556_v43  ;;  %1720 = vmatprep.subr.bf16.mxu1 %v2561_v44  ;;  %v2650_v43 = vld [vmem:[%s2735_s20 + $0x6b0] ss:$8 sps:$4 sm:$0xff]   ;;  %v2655_v44 = vld [vmem:[%s2735_s20 + $0x6c4] ss:$8 sps:$4 sm:$0xff]  }
  0xad   : > { %1843 = vmatprep.subr.bf16.mxu0 %v2564_v45  ;;  %v2653_v45 = vld [vmem:[%s2735_s20 + $0x6c0] ss:$8 sps:$4 sm:$0xff]  }
  0xaf   : > { %1721 = vmatpush1.bf16.msra.mxu1 %v2559_v46  ;;  %v2658_v46 = vld [vmem:[%s2735_s20 + $0x6d4] ss:$8 sps:$4 sm:$0xff]  }
  0xb0   : > { %1844 = vmatpush1.bf16.msra.mxu0 %v2562_v47  ;;  %1722 = vmatprep.subr.bf16.mxu1 %v2567_v48  ;;  %v2656_v47 = vld [vmem:[%s2735_s20 + $0x6d0] ss:$8 sps:$4 sm:$0xff]   ;;  %v2661_v48 = vld [vmem:[%s2735_s20 + $0x6e4] ss:$8 sps:$4 sm:$0xff]  }
  0xb1   : > { %1845 = vmatprep.subr.bf16.mxu0 %v2570_v49  ;;  %v2659_v49 = vld [vmem:[%s2735_s20 + $0x6e0] ss:$8 sps:$4 sm:$0xff]  }
  0xb3   : > { %1723 = vmatpush1.bf16.msra.mxu1 %v2565_v50  ;;  %v2664_v50 = vld [vmem:[%s2735_s20 + $0x6f4] ss:$8 sps:$4 sm:$0xff]  }
  0xb4   : > { %1846 = vmatpush1.bf16.msra.mxu0 %v2568_v51  ;;  %1724 = vmatprep.subr.bf16.mxu1 %v2573_v52  ;;  %v2662_v51 = vld [vmem:[%s2735_s20 + $0x6f0] ss:$8 sps:$4 sm:$0xff]   ;;  %v2039_v52 = vcombine.low %v2963_v17, %v2963_v17 }
  0xb5   : > { %1847 = vmatprep.subr.bf16.mxu0 %v2576_v53 }
  0xb7   : > { %1725 = vmatpush1.bf16.msra.mxu1 %v2571_v54 }
  0xb8   : > { %1848 = vmatpush1.bf16.msra.mxu0 %v2574_v55  ;;  %1726 = vmatprep.subr.bf16.mxu1 %v2579_v56 }
  0xb9   : > { %1849 = vmatprep.subr.bf16.mxu0 %v2582_v57 }
  0xbb   : > { %1727 = vmatpush1.bf16.msra.mxu1 %v2577_v58 }
  0xbc   : > { %1850 = vmatpush1.bf16.msra.mxu0 %v2580_v59  ;;  %1728 = vmatprep.subr.bf16.mxu1 %v2585_v60 }
  0xbd   : > { %1851 = vmatprep.subr.bf16.mxu0 %v2588_v61 }
  0xbf   : > { %1729 = vmatpush1.bf16.msra.mxu1 %v2583_v62 }
  0xc0   : > { %1852 = vmatpush1.bf16.msra.mxu0 %v2586_v63  ;;  %1730 = vmatprep.subr.bf16.mxu1 %v2591_v0  ;;  %v1917_v63 = vlaneseq (!%p2265_p6) }
  0xc1   : > { %1853 = vmatprep.subr.bf16.mxu0 %v2594_v1  ;;  %v1915_v1 = vld [vmem:[%s3038_s2] sm:$0x3] (!%p2265_p6) }
  0xc2   : > { %v1918_v0 = vshrl.u32 (!%p2265_p6), %v1917_v63, 7 }
  0xc3   : > { %1731 = vmatpush1.bf16.msra.mxu1 %v2589_v2 }
  0xc4   : > { %1854 = vmatpush1.bf16.msra.mxu0 %v2592_v3  ;;  %1732 = vmatprep.subr.bf16.mxu1 %v2597_v4  ;;  %v1919_v2 = vsub.s32 (!%p2265_p6), 0, %v1918_v0  ;;  %v1923_v3 = vsub.s32 (!%p2265_p6), 1, %v1918_v0 }
  0xc5   : > { %1855 = vmatprep.subr.bf16.mxu0 %v2600_v5 }
  0xc6   : > { %v1920_v4 = vrot.slane (!%p2265_p6), %v1915_v1, %v1919_v2  ;;  %v1924_v5 = vrot.slane (!%p2265_p6), %v1915_v1, %v1923_v3 }
  0xc7   : > { %1733 = vmatpush1.bf16.msra.mxu1 %v2595_v6 }
  0xc8   : > { %1856 = vmatpush1.bf16.msra.mxu0 %v2598_v7  ;;  %1734 = vmatprep.subr.bf16.mxu1 %v2603_v8 }
  0xc9   : > { %1857 = vmatprep.subr.bf16.mxu0 %v2606_v9 }
  0xcb   : > { %1735 = vmatpush1.bf16.msra.mxu1 %v2601_v10 }
  0xcc   : > { %1858 = vmatpush1.bf16.msra.mxu0 %v2604_v11  ;;  %1736 = vmatprep.subr.bf16.mxu1 %v2609_v12 }
  0xcd   : > { %1859 = vmatprep.subr.bf16.mxu0 %v2612_v13 }
  0xcf   : > { %1737 = vmatpush1.bf16.msra.mxu1 %v2607_v14 }
  0xd0   : > { %1860 = vmatpush1.bf16.msra.mxu0 %v2610_v15 }
  0xd1   : > { %1870 = vmatprep.subr.bf16.mxu0 %v2619_v16 }
  0xd2   : > { %1739 = vmatmul.mubr.bf16.vlgmr.msra.gmra.mrb[0].mxu1 %v2031_v20 }
  0xd3   : > { %1862 = vmatmul.mubr.bf16.vlgmr.msra.gmra.mrb[0].mxu0 %v2037_v21 }
  0xd4   : > { %1871 = vmatpush1.bf16.msra.mxu0 %v2617_v22  ;;  %1902 = vmatprep.mubr.bf16.mxu0 %v2040_v23 }
  0xd5   : > { %1872 = vmatprep.subr.bf16.mxu0 %v2622_v24 }
  0xd8   : > { %1873 = vmatpush1.bf16.msra.mxu0 %v2620_v18 }
  0xd9   : > { %1874 = vmatprep.subr.bf16.mxu0 %v2625_v19 }
  0xdc   : > { %1875 = vmatpush1.bf16.msra.mxu0 %v2623_v25 }
  0xdd   : > { %1876 = vmatprep.subr.bf16.mxu0 %v2628_v26 }
  0xe0   : > { %1877 = vmatpush1.bf16.msra.mxu0 %v2626_v27 }
  0xe1   : > { %1878 = vmatprep.subr.bf16.mxu0 %v2631_v28 }
  0xe4   : > { %1879 = vmatpush1.bf16.msra.mxu0 %v2629_v29 }
  0xe5   : > { %1880 = vmatprep.subr.bf16.mxu0 %v2634_v30 }
  0xe8   : > { %1881 = vmatpush1.bf16.msra.mxu0 %v2632_v31 }
  0xe9   : > { %1882 = vmatprep.subr.bf16.mxu0 %v2637_v32 }
  0xec   : > { %1883 = vmatpush1.bf16.msra.mxu0 %v2635_v33 }
  0xed   : > { %1884 = vmatprep.subr.bf16.mxu0 %v2640_v34 }
  0xf0   : > { %1885 = vmatpush1.bf16.msra.mxu0 %v2638_v35 }
  0xf1   : > { %1886 = vmatprep.subr.bf16.mxu0 %v2643_v36 }
  0xf4   : > { %1887 = vmatpush1.bf16.msra.mxu0 %v2641_v37 }
  0xf5   : > { %1888 = vmatprep.subr.bf16.mxu0 %v2646_v38 }
  0xf8   : > { %1889 = vmatpush1.bf16.msra.mxu0 %v2644_v39 }
  0xf9   : > { %1890 = vmatprep.subr.bf16.mxu0 %v2649_v40 }
  0xfc   : > { %1891 = vmatpush1.bf16.msra.mxu0 %v2647_v41 }
  0xfd   : > { %1892 = vmatprep.subr.bf16.mxu0 %v2652_v42 }
 0x100   : > { %1893 = vmatpush1.bf16.msra.mxu0 %v2650_v43 }
 0x101   : > { %1894 = vmatprep.subr.bf16.mxu0 %v2655_v44 }
 0x104   : > { %1895 = vmatpush1.bf16.msra.mxu0 %v2653_v45 }
 0x105   : > { %1896 = vmatprep.subr.bf16.mxu0 %v2658_v46 }
 0x108   : > { %1897 = vmatpush1.bf16.msra.mxu0 %v2656_v47 }
 0x109   : > { %1898 = vmatprep.subr.bf16.mxu0 %v2661_v48 }
 0x10c   : > { %1899 = vmatpush1.bf16.msra.mxu0 %v2659_v49 }
 0x10d   : > { %1900 = vmatprep.subr.bf16.mxu0 %v2664_v50 }
 0x110   : > { %1901 = vmatpush1.bf16.msra.mxu0 %v2662_v51 }
 0x113   : > { %1903 = vmatmul.mubr.bf16.vlgmr.msra.gmra.mrb[0].mxu0 %v2039_v52 }
 0x1a5   : > { %v1740_v53 = vpop.f32.mrb[0].mxu1 }
 0x1a6   : > { %v1742_v54 = vpop.f32.mrb[1].mxu1 }
 0x1a7   : > { %v1744_v55 = vpop.f32.mrb[2].mxu1 }
 0x1a8   : > { %v1745_v56 = vpop.f32.mrb[3].mxu1 }
 0x1e3   : > { %1914 = sbr.rel (%p2265_p6) target bundleno = 493 (0x1ed), region = 36 }
 0x1e6   : > { %v1904_v57 = vpop.f32.mrb[0].mxu0 }
 0x1e7   : > { %v2271_v58 = vadd.f32 %v1904_v57, %v1740_v53  ;;  %v1906_v59 = vpop.f32.mrb[1].mxu0 }
 0x1e8   : > { %v2272_v60 = vadd.f32 %v1906_v59, %v1742_v54  ;;  %v1908_v61 = vpop.f32.mrb[2].mxu0 }
 0x1e9   : > { %v1909_v62 = vpop.f32.mrb[3].mxu0  ;;  %v1927_v6 = vadd.f32 (!%p2265_p6), %v2271_v58, %v1920_v4 }
 0x1ea   : > { %v1928_v7 = vadd.f32 %v2272_v60, %v1924_v5 }
 0x1eb   : > { %1929 = vst [vmem:[%s3039_s3] sm:$0xff] %v1927_v6 }
 0x1ec   : > { %1930 = vst [vmem:[%s3039_s3 + $0x8] sm:$0xff] %v1928_v7 }
 0x1ed PF: > { %p2266_p7 = scmp.eq.s32.totalorder %s2681_s12, 0 }
 0x1ef   : > { %1934 = sbr.rel (%p2266_p7) target bundleno = 503 (0x1f7), region = 40 }
 0x1f2   : > { %v1935_v8 = vld [vmem:[%s3039_s3] sm:$0xff] (!%p2266_p7) }
 0x1f3   : > { %v1936_v9 = vld [vmem:[%s3039_s3 + $0x8] sm:$0xff] (!%p2266_p7)  ;;  %v1937_v10 = vadd.f32 (!%p2266_p7), %v2271_v58, %v1935_v8 }
 0x1f4   : > { %v1938_v11 = vadd.f32 (!%p2266_p7), %v2272_v60, %v1936_v9 }
 0x1f5   : > { %1939 = vst [vmem:[%s3039_s3] sm:$0xff] (!%p2266_p7), %v1937_v10 }
 0x1f6   : > { %1940 = vst [vmem:[%s3039_s3 + $0x8] sm:$0xff] %v1938_v11 }
 0x1f7 PF: > { %s13_s14 = sadd.s32 1, %s2689_s14   ;;  %s3040_s12 = smov %s2685_s13 }
 0x1f8   : > { %p10_p8 = scmp.ge.s32.totalorder %s13_s14, 9   ;;  %s3041_s13 = smov %s3043_s15 }
 0x1fa   :  { %12 = sbr.rel (!%p10_p8) target bundleno = 2 (0x2), region = 73 }

// kernel: tiny_mask_rcnn_forward.8
= control target key start
LH: loop header
LB: loop body
LE: loop exit
PB: predicated region body
PF: predicated region fallthrough
CT: control target
= control target key end

     0   :  { %s351_s1 = inlined_call_operand.vmem [shape: bf16[256,128], index: 1, kind: input, shape index: {}]   ;;  %s352_s0 = inlined_call_operand.vmem [shape: bf16[8,256], index: 0, kind: input, shape index: {}]   ;;  %s353_s2 = inlined_call_operand.vmem [shape: f32[1,128], index: 2, kind: input, shape index: {}]   ;;  %s354_s3 = inlined_call_operand.vmem [shape: f32[8,128], index: 3, kind: output, shape index: {}]  }
   0x1   :  { %v256_v0 = vld [vmem:[%s351_s1 + $0x40] sm:$0xff]   ;;  %v258_v2 = vld [vmem:[%s351_s1 + $0x48] sm:$0xff]   ;;  %v260_v4 = vld [vmem:[%s351_s1 + $0x50] sm:$0xff]  }
   0x2   :  { %v257_v1 = vld [vmem:[%s351_s1] sm:$0xff]   ;;  %234 = vmatprep.subr.bf16.mxu0 %v256_v0  ;;  %v259_v3 = vld [vmem:[%s351_s1 + $0x8] sm:$0xff]   ;;  %v261_v5 = vld [vmem:[%s351_s1 + $0x10] sm:$0xff]  }
   0x3   :  { %235 = vmatpush3.bf16.msra.mxu0 %v257_v1  ;;  %v262_v6 = vld [vmem:[%s351_s1 + $0x58] sm:$0xff]   ;;  %v264_v8 = vld [vmem:[%s351_s1 + $0x60] sm:$0xff]   ;;  %v266_v10 = vld [vmem:[%s351_s1 + $0x68] sm:$0xff]  }
   0x4   :  { %236 = vmatprep.subr.bf16.mxu0 %v258_v2  ;;  %v263_v7 = vld [vmem:[%s351_s1 + $0x18] sm:$0xff]   ;;  %v265_v9 = vld [vmem:[%s351_s1 + $0x20] sm:$0xff]   ;;  %v267_v13 = vld [vmem:[%s351_s1 + $0x28] sm:$0xff]  }
   0x5   :  { %v15_v11 = vld [vmem:[%s352_s0] sm:$0xff]  ;;  %v268_v14 = vld [vmem:[%s351_s1 + $0x70] sm:$0xff]   ;;  %v270_v16 = vld [vmem:[%s351_s1 + $0x78] sm:$0xff]  }
   0x6   :  { %v216_v12 = vcombine.high %v15_v11, %v15_v11  ;;  %v269_v15 = vld [vmem:[%s351_s1 + $0x30] sm:$0xff]   ;;  %v271_v17 = vld [vmem:[%s351_s1 + $0x38] sm:$0xff]   ;;  %v215_v18 = vcombine.low %v15_v11, %v15_v11  ;;  %v233_v21 = vld [vmem:[%s353_s2] ss:$0 sm:$0xff] }
   0x7   :  { %237 = vmatpush3.bf16.msra.mxu0 %v259_v3 }
   0x8   :  { %238 = vmatprep.subr.bf16.mxu0 %v260_v4  ;;  %183 = vmatprep.mubr.bf16.mxu0 %v216_v12 }
   0xb   :  { %239 = vmatpush3.bf16.msra.mxu0 %v261_v5 }
   0xc   :  { %240 = vmatprep.subr.bf16.mxu0 %v262_v6 }
   0xf   :  { %241 = vmatpush3.bf16.msra.mxu0 %v263_v7 }
  0x10   :  { %242 = vmatprep.subr.bf16.mxu0 %v264_v8 }
  0x13   :  { %243 = vmatpush3.bf16.msra.mxu0 %v265_v9 }
  0x14   :  { %244 = vmatprep.subr.bf16.mxu0 %v266_v10 }
  0x17   :  { %245 = vmatpush3.bf16.msra.mxu0 %v267_v13 }
  0x18   :  { %246 = vmatprep.subr.bf16.mxu0 %v268_v14 }
  0x1b   :  { %247 = vmatpush3.bf16.msra.mxu0 %v269_v15 }
  0x1c   :  { %248 = vmatprep.subr.bf16.mxu0 %v270_v16 }
  0x1f   :  { %249 = vmatpush3.bf16.msra.mxu0 %v271_v17 }
  0x22   :  { %184 = vmatmul.mubr.bf16.vlgmr.msra.gmra.mrb[0].mxu0 %v215_v18 }
  0xf5   :  { %v250_v19 = vpop.f32.mrb[0].mxu0 }
  0xf6   :  { %v251_v20 = vpop.f32.mrb[1].mxu0 }
  0xf7   :  { %v252_v22 = vadd.f32 %v251_v20, %v250_v19  ;;  %v253_v23 = vpop.f32.mrb[2].mxu0 }
  0xf8   :  { %v254_v24 = vpop.f32.mrb[3].mxu0 }
  0xf9   :  { %v202_v25 = vadd.f32 %v252_v22, %v233_v21 }
  0xfb   :  { %203 = vst [vmem:[%s354_s3] sm:$0xff] %v202_v25 }

// kernel: tiny_mask_rcnn_forward.9
= control target key start
LH: loop header
LB: loop body
LE: loop exit
PB: predicated region body
PF: predicated region fallthrough
CT: control target
= control target key end

     0   :  { %s969_s12 = smov 0   ;;  %s971_s13 = smov 0   ;;  %s1139_s0 = inlined_call_operand.vmem [shape: bf16[1568,64], index: 0, kind: input, shape index: {}]   ;;  %s1140_s1 = inlined_call_operand.vmem [shape: bf16[64,16], index: 1, kind: input, shape index: {}]   ;;  %s1141_s2 = inlined_call_operand.vmem [shape: f32[1,16], index: 2, kind: input, shape index: {}]   ;;  %s1142_s3 = inlined_call_operand.vmem [shape: f32[1568,16], index: 3, kind: output, shape index: {}]  }
   0x1   :  { %s973_s14 = smov 0  }
   0x2 LB: > { %s25_s15 = sadd.s32 1, %s943_s13  ;;  %p783_p0 = scmp.ge.s32.totalorder %s947_s14, 1  ;;  %s947_s14 = sphi %s973_s14, %s13_s14   ;;  %s943_s13 = sphi %s971_s13, %s1144_s13   ;;  %s939_s12 = sphi %s969_s12, %s1143_s12  }
   0x3   : > { %p27_p1 = scmp.ge.s32.totalorder %s25_s15, 7  ;;  %p166_p2 = scmp.lt.s32.totalorder %s947_s14, 8 }
   0x5   : > { %s1146_s15 = smov (%p27_p1, %s25_s15), 0  ;;  %p167_p3 = pnand %p783_p0, %p166_p2 }
   0x6   : > { %v907_v0 = vld [vmem:[%s1140_s1] sm:$0xff] (!%p167_p3)   ;;  %s198_s18 = smul.u32 (!%p167_p3), 28, %s939_s12  ;;  %v908_v1 = vld [vmem:[%s1140_s1 + $0x8] sm:$0xff] (!%p167_p3)   ;;  %v909_v2 = vld [vmem:[%s1140_s1 + $0x10] sm:$0xff] (!%p167_p3)   ;;  %vm350_vm0 = vcmask (!%p167_p3), 523264   ;;  %vm577_vm1 = vcmask (!%p167_p3), 130048  }
   0x7   : > { %170 = sbr.rel (%p167_p3) target bundleno = 265 (0x109), region = 32  ;;  %839 = vmatprep.subr.bf16.mxu0 (!%p167_p3), %v907_v0  ;;  %875 = vmatprep.subr.bf16.mxu1 (!%p167_p3), %v907_v0  ;;  %v910_v3 = vld [vmem:[%s1140_s1 + $0x18] sm:$0xff] (!%p167_p3)   ;;  %v1039_v18 = vld [vmem:[%s1141_s2] ss:$0 sm:$0xff] (!%p167_p3) }
   0x8   : > { %p199_p4 = scmp.lt.s32.totalorder (!%p167_p3), %s198_s18, 195  ;;  %840 = vmatpush3.bf16.msra.mxu0 (!%p167_p3), %v907_v0  ;;  %879 = vmatpush3.bf16.msra.mxu1 (!%p167_p3), %v907_v0 }
   0x9   : > { %841 = vmatprep.subr.bf16.mxu0 (!%p167_p3), %v908_v1  ;;  %876 = vmatprep.subr.bf16.mxu1 (!%p167_p3), %v908_v1 }
   0xc   : > { %842 = vmatpush3.bf16.msra.mxu0 (!%p167_p3), %v908_v1  ;;  %880 = vmatpush3.bf16.msra.mxu1 (!%p167_p3), %v908_v1 }
   0xd   : > { %843 = vmatprep.subr.bf16.mxu0 (!%p167_p3), %v909_v2  ;;  %877 = vmatprep.subr.bf16.mxu1 (!%p167_p3), %v909_v2 }
   0xe   : > { %s1148_s18 = smov (!%p199_p4, %s198_s18), 195 }
   0xf   : > { %s784_s23 = sshll.u32 %s1148_s18, 2  ;;  %s785_s29 = sshll.u32 %s1148_s18, 3 }
  0x10   : > { %s1005_s28 = scalar_lea.vmem %s1139_s0, %s784_s23  ;;  %844 = vmatpush3.bf16.msra.mxu0 %v909_v2  ;;  %881 = vmatpush3.bf16.msra.mxu1 %v909_v2  ;;  %s1044_s7 = scalar_lea.vmem %s1142_s3, %s785_s29 }
  0x11   : > { %v911_v4 = vld [vmem:[%s1005_s28] sm:$0xff]   ;;  %845 = vmatprep.subr.bf16.mxu0 %v910_v3  ;;  %v912_v6 = vld [vmem:[%s1005_s28 + $0x8] sm:$0xff]   ;;  %878 = vmatprep.subr.bf16.mxu1 %v910_v3  ;;  %v915_v8 = vld [vmem:[%s1005_s28 + $0x10] sm:$0xff]  }
  0x12   : > { %847 = vmatprep.mubr.msk.bf16.mxu0 %vm350_vm0, %v911_v4  ;;  %v913_v5 = vld [vmem:[%s1005_s28 + $0x40] sm:$0xff]   ;;  %v914_v7 = vld [vmem:[%s1005_s28 + $0x48] sm:$0xff]   ;;  %v917_v9 = vld [vmem:[%s1005_s28 + $0x50] sm:$0xff]  }
  0x13   : > { %863 = vmatprep.mubr.msk.bf16.mxu1 %vm350_vm0, %v913_v5  ;;  %v916_v10 = vld [vmem:[%s1005_s28 + $0x18] sm:$0xff]   ;;  %v919_v12 = vld [vmem:[%s1005_s28 + $0x20] sm:$0xff]   ;;  %v920_v14 = vld [vmem:[%s1005_s28 + $0x28] sm:$0xff]  }
  0x14   : > { %846 = vmatpush3.bf16.msra.mxu0 %v910_v3  ;;  %882 = vmatpush3.bf16.msra.mxu1 %v910_v3  ;;  %v918_v11 = vld [vmem:[%s1005_s28 + $0x58] sm:$0xff]   ;;  %v921_v13 = vld [vmem:[%s1005_s28 + $0x60] sm:$0xff]   ;;  %v922_v15 = vld [vmem:[%s1005_s28 + $0x68] sm:$0xff]  }
  0x15   : > { %v923_v16 = vld [vmem:[%s1005_s28 + $0x30] sm:$0xff]   ;;  %v924_v17 = vld [vmem:[%s1005_s28 + $0x38] sm:$0xff]  }
  0x17   : > { %848 = vmatmul.mubr.msk.bf16.vlgmr.msra.gmra.mrb[0].mxu0 %vm350_vm0, %v912_v6  ;;  %864 = vmatmul.mubr.msk.bf16.vlgmr.msra.gmra.mrb[0].mxu1 %vm350_vm0, %v914_v7 }
  0x18   : > { %851 = vmatprep.mubr.msk.bf16.mxu0 %vm350_vm0, %v915_v8  ;;  %867 = vmatprep.mubr.msk.bf16.mxu1 %vm350_vm0, %v917_v9 }
  0x1f   : > { %852 = vmatmul.mubr.msk.bf16.gmra.mrb[4].mxu0 %vm350_vm0, %v916_v10  ;;  %868 = vmatmul.mubr.msk.bf16.gmra.mrb[4].mxu1 %vm350_vm0, %v918_v11 }
  0x20   : > { %855 = vmatprep.mubr.msk.bf16.mxu0 %vm350_vm0, %v919_v12  ;;  %871 = vmatprep.mubr.msk.bf16.mxu1 %vm350_vm0, %v921_v13 }
  0x27   : > { %856 = vmatmul.mubr.msk.bf16.gmra.mrb[8].mxu0 %vm350_vm0, %v920_v14  ;;  %872 = vmatmul.mubr.msk.bf16.gmra.mrb[8].mxu1 %vm350_vm0, %v922_v15 }
  0x28   : > { %859 = vmatprep.mubr.msk.bf16.mxu0 %vm350_vm0, %v923_v16 }
  0x2f   : > { %860 = vmatmul.mubr.msk.bf16.gmra.mrb[12].mxu0 %vm350_vm0, %v924_v17 }
  0xea   : > { %v849_v19 = vpop.f32.mrb[0].mxu0  ;;  %v865_v20 = vpop.f32.mrb[0].mxu1 }
  0xeb   : > { %v551_v21 = vadd.f32 %v849_v19, %v1039_v18  ;;  %v427_v22 = vpop.f32.mrb[1].mxu0  ;;  %v567_v23 = vadd.f32 %v865_v20, %v1039_v18  ;;  %v491_v24 = vpop.f32.mrb[1].mxu1 }
  0xec   : > { %v549_v25 = vadd.f32 %v1039_v18, %v427_v22  ;;  %v850_v26 = vpop.f32.mrb[2].mxu0  ;;  %v565_v27 = vadd.f32 %v1039_v18, %v491_v24  ;;  %v866_v28 = vpop.f32.mrb[2].mxu1 }
  0xed   : > { %580 = vst.msk [vmem:[%s1044_s7 + $0x10] sm:$0xff] %vm577_vm1, %v551_v21  ;;  %v552_v29 = vadd.f32 %v850_v26, %v1039_v18  ;;  %v430_v30 = vpop.f32.mrb[3].mxu0  ;;  %596 = vst.msk [vmem:[%s1044_s7 + $0x90] sm:$0xff] %vm577_vm1, %v567_v23  ;;  %v568_v31 = vadd.f32 %v866_v28, %v1039_v18  ;;  %v494_v32 = vpop.f32.mrb[3].mxu1 }
  0xee   : > { %578 = vst.msk [vmem:[%s1044_s7] sm:$0xff] %vm577_vm1, %v549_v25  ;;  %v550_v33 = vadd.f32 %v1039_v18, %v430_v30  ;;  %594 = vst.msk [vmem:[%s1044_s7 + $0x80] sm:$0xff] %vm577_vm1, %v565_v27  ;;  %v566_v34 = vadd.f32 %v1039_v18, %v494_v32 }
  0xef   : > { %581 = vst.msk [vmem:[%s1044_s7 + $0x18] sm:$0xff] %vm577_vm1, %v552_v29  ;;  %597 = vst.msk [vmem:[%s1044_s7 + $0x98] sm:$0xff] %vm577_vm1, %v568_v31 }
  0xf0   : > { %579 = vst.msk [vmem:[%s1044_s7 + $0x8] sm:$0xff] %vm577_vm1, %v550_v33  ;;  %595 = vst.msk [vmem:[%s1044_s7 + $0x88] sm:$0xff] %vm577_vm1, %v566_v34 }
  0xf2   : > { %v853_v35 = vpop.f32.mrb[4].mxu0  ;;  %v869_v36 = vpop.f32.mrb[4].mxu1 }
  0xf3   : > { %v555_v37 = vadd.f32 %v853_v35, %v1039_v18  ;;  %v443_v38 = vpop.f32.mrb[5].mxu0  ;;  %v571_v39 = vadd.f32 %v869_v36, %v1039_v18  ;;  %v507_v40 = vpop.f32.mrb[5].mxu1 }
  0xf4   : > { %v553_v41 = vadd.f32 %v1039_v18, %v443_v38  ;;  %v854_v42 = vpop.f32.mrb[6].mxu0  ;;  %v569_v43 = vadd.f32 %v1039_v18, %v507_v40  ;;  %v870_v44 = vpop.f32.mrb[6].mxu1 }
  0xf5   : > { %584 = vst.msk [vmem:[%s1044_s7 + $0x30] sm:$0xff] %vm577_vm1, %v555_v37  ;;  %v556_v45 = vadd.f32 %v854_v42, %v1039_v18  ;;  %v446_v46 = vpop.f32.mrb[7].mxu0  ;;  %600 = vst.msk [vmem:[%s1044_s7 + $0xb0] sm:$0xff] %vm577_vm1, %v571_v39  ;;  %v572_v47 = vadd.f32 %v870_v44, %v1039_v18  ;;  %v510_v48 = vpop.f32.mrb[7].mxu1 }
  0xf6   : > { %582 = vst.msk [vmem:[%s1044_s7 + $0x20] sm:$0xff] %vm577_vm1, %v553_v41  ;;  %v554_v49 = vadd.f32 %v1039_v18, %v446_v46  ;;  %598 = vst.msk [vmem:[%s1044_s7 + $0xa0] sm:$0xff] %vm577_vm1, %v569_v43  ;;  %v570_v50 = vadd.f32 %v1039_v18, %v510_v48 }
  0xf7   : > { %585 = vst.msk [vmem:[%s1044_s7 + $0x38] sm:$0xff] %vm577_vm1, %v556_v45  ;;  %601 = vst.msk [vmem:[%s1044_s7 + $0xb8] sm:$0xff] %vm577_vm1, %v572_v47 }
  0xf8   : > { %583 = vst.msk [vmem:[%s1044_s7 + $0x28] sm:$0xff] %vm577_vm1, %v554_v49  ;;  %599 = vst.msk [vmem:[%s1044_s7 + $0xa8] sm:$0xff] %vm577_vm1, %v570_v50 }
  0xfa   : > { %v857_v51 = vpop.f32.mrb[8].mxu0  ;;  %v873_v52 = vpop.f32.mrb[8].mxu1 }
  0xfb   : > { %v559_v53 = vadd.f32 %v857_v51, %v1039_v18  ;;  %v459_v54 = vpop.f32.mrb[9].mxu0  ;;  %v575_v55 = vadd.f32 %v873_v52, %v1039_v18  ;;  %v523_v56 = vpop.f32.mrb[9].mxu1 }
  0xfc   : > { %v557_v57 = vadd.f32 %v1039_v18, %v459_v54  ;;  %v858_v58 = vpop.f32.mrb[10].mxu0  ;;  %v573_v59 = vadd.f32 %v1039_v18, %v523_v56  ;;  %v874_v60 = vpop.f32.mrb[10].mxu1 }
  0xfd   : > { %588 = vst.msk [vmem:[%s1044_s7 + $0x50] sm:$0xff] %vm577_vm1, %v559_v53  ;;  %v560_v61 = vadd.f32 %v858_v58, %v1039_v18  ;;  %v462_v62 = vpop.f32.mrb[11].mxu0  ;;  %604 = vst.msk [vmem:[%s1044_s7 + $0xd0] sm:$0xff] %vm577_vm1, %v575_v55  ;;  %v576_v63 = vadd.f32 %v874_v60, %v1039_v18  ;;  %v526_v0 = vpop.f32.mrb[11].mxu1 }
  0xfe   : > { %586 = vst.msk [vmem:[%s1044_s7 + $0x40] sm:$0xff] %vm577_vm1, %v557_v57  ;;  %v558_v1 = vadd.f32 %v1039_v18, %v462_v62  ;;  %602 = vst.msk [vmem:[%s1044_s7 + $0xc0] sm:$0xff] %vm577_vm1, %v573_v59  ;;  %v574_v2 = vadd.f32 %v1039_v18, %v526_v0 }
  0xff   : > { %589 = vst.msk [vmem:[%s1044_s7 + $0x58] sm:$0xff] %vm577_vm1, %v560_v61  ;;  %605 = vst.msk [vmem:[%s1044_s7 + $0xd8] sm:$0xff] %vm577_vm1, %v576_v63 }
 0x100   : > { %587 = vst.msk [vmem:[%s1044_s7 + $0x48] sm:$0xff] %vm577_vm1, %v558_v1  ;;  %603 = vst.msk [vmem:[%s1044_s7 + $0xc8] sm:$0xff] %vm577_vm1, %v574_v2 }
 0x102   : > { %v861_v3 = vpop.f32.mrb[12].mxu0 }
 0x103   : > { %v563_v4 = vadd.f32 %v861_v3, %v1039_v18  ;;  %v475_v5 = vpop.f32.mrb[13].mxu0 }
 0x104   : > { %v561_v6 = vadd.f32 %v1039_v18, %v475_v5  ;;  %v862_v7 = vpop.f32.mrb[14].mxu0 }
 0x105   : > { %592 = vst.msk [vmem:[%s1044_s7 + $0x70] sm:$0xff] %vm577_vm1, %v563_v4  ;;  %v564_v8 = vadd.f32 %v862_v7, %v1039_v18  ;;  %v478_v9 = vpop.f32.mrb[15].mxu0 }
 0x106   : > { %590 = vst.msk [vmem:[%s1044_s7 + $0x60] sm:$0xff] %vm577_vm1, %v561_v6  ;;  %v562_v10 = vadd.f32 %v1039_v18, %v478_v9 }
 0x107   : > { %593 = vst.msk [vmem:[%s1044_s7 + $0x78] sm:$0xff] %vm577_vm1, %v564_v8 }
 0x108   : > { %591 = vst.msk [vmem:[%s1044_s7 + $0x68] sm:$0xff] %vm577_vm1, %v562_v10 }
 0x109 PF: > { %s13_s14 = sadd.s32 1, %s947_s14   ;;  %s1143_s12 = smov %s943_s13 }
 0x10a   : > { %p10_p5 = scmp.ge.s32.totalorder %s13_s14, 9   ;;  %s1144_s13 = smov %s1146_s15 }
 0x10c   :  { %12 = sbr.rel (!%p10_p5) target bundleno = 2 (0x2), region = 73 }

</bundles_post_ra>
